<compile_context>
chip_gen: v7x
topology: tpu7x:2x2x1
jax: 0.10.0
libtpu: 0.0.40
codegen_flags: <defaults>
</compile_context>

<pallas_src>
import jax
import jax.numpy as jnp
from jax import lax
from jax.experimental import pallas as pl
from jax.experimental.pallas import tpu as pltpu


# --------------------------- parameter packing ---------------------------
def _pack_params(p, W):
    """Pack every small per-channel vector / tiled tap weight into one table.

    Returns:
      ptab : (55, W*C) f32 — rows are lane-dense (tiled over W) vectors.
      wbig : (3*W*C, W*C_out) f32 — block-diagonal kron expansion of the
             (3C, C_out) adjust weight, so the whole concat+1x1 conv is one dot.
      idx  : dict name -> first row index in ptab.
    """
    f32 = jnp.float32
    C = p["c1w"].shape[-1]

    def tile(v):                       # per-channel (C,) -> lane-dense (W*C,)
        return jnp.tile(jnp.asarray(v, f32).reshape(-1), W)

    rows, idx = [], {}

    def add(name, vecs):
        idx[name] = len(rows)
        rows.extend(vecs)

    add("w1",  [tile(p["c1w"][i, j]) for i in range(3) for j in range(3)])
    add("w01", [tile(p["c01w"][0, j]) for j in range(3)])   # 1x3 (W taps)
    add("w02", [tile(p["c02w"][i, 0]) for i in range(3)])   # 3x1 (H taps)
    add("w11", [tile(p["c11w"][0, j]) for j in range(5)])   # 1x5
    add("w12", [tile(p["c12w"][i, 0]) for i in range(5)])   # 5x1
    add("w21", [tile(p["c21w"][0, j]) for j in range(7)])   # 1x7
    add("w22", [tile(p["c22w"][i, 0]) for i in range(7)])   # 7x1
    for nm in ("c1b", "c01b", "c02b", "c11b", "c12b", "c21b", "c22b",
               "g0", "be0", "g1", "be1", "g2", "be2", "g3", "be3", "adjb"):
        add(nm, [tile(p[nm])])
    ptab = jnp.stack(rows, axis=0)                          # (55, W*C)

    eye_w = jnp.eye(W, dtype=f32)
    wbig = jnp.concatenate(
        [jnp.kron(eye_w, jnp.asarray(p[k], f32))
         for k in ("adjw1", "adjw2", "adjw3")], axis=0)     # (3*W*C, W*C_out)
    return ptab, wbig, idx


# ------------------------------- kernel -------------------------------
def _make_kernel(N, H, W, C, idx):
    R, WC = N * H, W * C
    EPS = 1e-5
    inv_cnt = 1.0 / float(N * H * W)   # elements per channel for BN stats

    def kernel(x_ref, ptab_ref, wbig_ref, o_ref):
        x = x_ref[...]                                     # (R, WC) f32

        def prow(i):                                       # (1, WC) table row
            return ptab_ref[i:i + 1, :]

        # Per-row (h) validity masks for H-direction taps, computed once.
        ridx = lax.broadcasted_iota(jnp.int32, (R, WC), 0)
        hpos = (ridx & (H - 1)) if (H & (H - 1)) == 0 else (ridx % H)
        rmask = {d: ((hpos + d >= 0) & (hpos + d < H)).astype(jnp.float32)
                 for d in (-3, -2, -1, 1, 2, 3)}

        # -------- register-resident shifted views (zero halo) --------
        def wshift(v, dj):      # v[:, w*C+c] -> v[:, (w+dj)*C+c], 0 outside W
            if dj == 0:
                return v
            k = dj * C
            z = jnp.zeros((R, abs(k)), jnp.float32)
            if dj > 0:
                return jnp.concatenate([v[:, k:], z], axis=1)
            return jnp.concatenate([z, v[:, :WC + k]], axis=1)

        def hshift(v, di):      # v[(n,h), :] -> v[(n,h+di), :], 0 outside batch
            if di == 0:
                return v
            z = jnp.zeros((abs(di), WC), jnp.float32)
            if di > 0:
                y = jnp.concatenate([v[di:, :], z], axis=0)
            else:
                y = jnp.concatenate([z, v[:R + di, :]], axis=0)
            return y * rmask[di]

        # ---------------- depthwise convolutions ----------------
        def conv_1xk(v, w0, k, b):           # 1xK, W direction
            acc = None
            for j in range(k):
                t = wshift(v, j - k // 2) * prow(w0 + j)
                acc = t if acc is None else acc + t
            return acc + prow(b)

        def conv_kx1(v, w0, k, b):           # Kx1, H direction
            acc = None
            for i in range(k):
                t = hshift(v, i - k // 2) * prow(w0 + i)
                acc = t if acc is None else acc + t
            return acc + prow(b)

        def conv_3x3(v, w0, b):
            acc = None
            for i in range(3):
                vi = hshift(v, i - 1)
                for j in range(3):
                    t = wshift(vi, j - 1) * prow(w0 + i * 3 + j)
                    acc = t if acc is None else acc + t
            return acc + prow(b)

        # -------- train-mode BatchNorm (one-pass stats) + ReLU --------
        def bn_relu(v, g, be):
            s1 = jnp.sum(v, axis=0, keepdims=True)          # (1, WC)
            s2 = jnp.sum(v * v, axis=0, keepdims=True)      # (1, WC)
            sh = C
            while sh < WC:      # fold the W groups: every lane ends up holding
                s1 = s1 + pltpu.roll(s1, shift=sh, axis=1)  # its channel's sum
                s2 = s2 + pltpu.roll(s2, shift=sh, axis=1)
                sh *= 2
            mean = s1 * inv_cnt
            var = s2 * inv_cnt - mean * mean                # biased (train mode)
            a = prow(g) * lax.rsqrt(var + EPS)
            bsh = prow(be) - mean * a
            return jnp.maximum(v * a + bsh, 0.0)

        # stem: conv1 (3x3 depthwise) -> bn0 -> relu
        x0 = bn_relu(conv_3x3(x, idx["w1"], idx["c1b"]), idx["g0"], idx["be0"])

        # three separable branches
        br1 = bn_relu(conv_kx1(conv_1xk(x0, idx["w01"], 3, idx["c01b"]),
                               idx["w02"], 3, idx["c02b"]),
                      idx["g1"], idx["be1"])
        br2 = bn_relu(conv_kx1(conv_1xk(x0, idx["w11"], 5, idx["c11b"]),
                               idx["w12"], 5, idx["c12b"]),
                      idx["g2"], idx["be2"])
        br3 = bn_relu(conv_kx1(conv_1xk(x0, idx["w21"], 7, idx["c21b"]),
                               idx["w22"], 7, idx["c22b"]),
                      idx["g3"], idx["be3"])

        # adjust: concat + 1x1 conv == one lane-dense MXU dot (default precision)
        cat = jnp.concatenate([br1, br2, br3], axis=1)      # (R, 3*WC)
        out = jnp.dot(cat, wbig_ref[...],
                      preferred_element_type=jnp.float32)   # (R, W*C_out)
        o_ref[...] = out + prow(idx["adjb"])

    return kernel


# ------------------------------- wrapper -------------------------------
def inception_block_forward(x_nchw, p):
    """NCHW in -> NCHW out, matching InceptionBlock.forward."""
    N, C, H, W = x_nchw.shape
    assert (W & (W - 1)) == 0, "BN lane fold assumes W is a power of two"
    C_out = p["adjw1"].shape[1]

    # lane-dense packing: (N, C, H, W) -> (N*H, W*C)
    x2d = jnp.transpose(x_nchw.astype(jnp.float32),
                        (0, 2, 3, 1)).reshape(N * H, W * C)
    ptab, wbig, idx = _pack_params(p, W)

    out2d = pl.pallas_call(
        _make_kernel(N, H, W, C, idx),
        out_shape=jax.ShapeDtypeStruct((N * H, W * C_out), jnp.float32),
        in_specs=[pl.BlockSpec(memory_space=pltpu.MemorySpace.VMEM)] * 3,
        out_specs=pl.BlockSpec(memory_space=pltpu.MemorySpace.VMEM),
    )(x2d, ptab, wbig)

    out = out2d.reshape(N, H, W, C_out)
    return jnp.transpose(out, (0, 3, 1, 2))                 # back to NCHW


# --------------------------- plain-JAX reference ---------------------------
def _ref_forward_nhwc(x, p):
    hp = lax.Precision.HIGHEST

    def dwconv(z, w, b):
        kh, kw, c = w.shape
        y = lax.conv_general_dilated(
            z, w.reshape(kh, kw, 1, c), (1, 1),
            ((kh // 2, kh // 2), (kw // 2, kw // 2)),
            dimension_numbers=("NHWC", "HWIO", "NHWC"),
            feature_group_count=c, precision=hp)
        return y + b.reshape(1, 1, 1, c)

    def bn_relu(z, g, b, eps=1e-5):
        mean = jnp.mean(z, axis=(0, 1, 2), keepdims=True)
        var = jnp.mean((z - mean) ** 2, axis=(0, 1, 2), keepdims=True)
        y = (z - mean) / jnp.sqrt(var + eps) * g.reshape(1, 1, 1, -1) \
            + b.reshape(1, 1, 1, -1)
        return jnp.maximum(y, 0.0)

    x0 = bn_relu(dwconv(x, p["c1w"], p["c1b"]), p["g0"], p["be0"])
    b1 = bn_relu(dwconv(dwconv(x0, p["c01w"], p["c01b"]), p["c02w"], p["c02b"]),
                 p["g1"], p["be1"])
    b2 = bn_relu(dwconv(dwconv(x0, p["c11w"], p["c11b"]), p["c12w"], p["c12b"]),
                 p["g2"], p["be2"])
    b3 = bn_relu(dwconv(dwconv(x0, p["c21w"], p["c21b"]), p["c22w"], p["c22b"]),
                 p["g3"], p["be3"])
    # adjust at default matmul precision (mirrors the kernel's MXU dot)
    out = (jnp.einsum("nhwi,io->nhwo", b1, p["adjw1"])
           + jnp.einsum("nhwi,io->nhwo", b2, p["adjw2"])
           + jnp.einsum("nhwi,io->nhwo", b3, p["adjw3"])
           + p["adjb"].reshape(1, 1, 1, -1))
    return out


# --------------------------- deterministic params ---------------------------
def make_params(key, C):
    keys = iter(jax.random.split(key, 32))

    def dw_w(kh, kw):  # depthwise weight (KH, KW, C), PyTorch-style uniform
        bound = 1.0 / jnp.sqrt(kh * kw)
        return jax.random.uniform(next(keys), (kh, kw, C), jnp.float32,
                                  -bound, bound)

    def bias(fan_in, n=None):
        n = C if n is None else n
        bound = 1.0 / jnp.sqrt(fan_in)
        return jax.random.uniform(next(keys), (1, n), jnp.float32, -bound, bound)

    p = {
        "c1w": dw_w(3, 3), "c1b": bias(9),
        "g0": jnp.ones((1, C), jnp.float32), "be0": jnp.zeros((1, C), jnp.float32),
        "c01w": dw_w(1, 3), "c01b": bias(3),
        "c02w": dw_w(3, 1), "c02b": bias(3),
        "g1": jnp.ones((1, C), jnp.float32), "be1": jnp.zeros((1, C), jnp.float32),
        "c11w": dw_w(1, 5), "c11b": bias(5),
        "c12w": dw_w(5, 1), "c12b": bias(5),
        "g2": jnp.ones((1, C), jnp.float32), "be2": jnp.zeros((1, C), jnp.float32),
        "c21w": dw_w(1, 7), "c21b": bias(7),
        "c22w": dw_w(7, 1), "c22b": bias(7),
        "g3": jnp.ones((1, C), jnp.float32), "be3": jnp.zeros((1, C), jnp.float32),
    }
    # adjust: 1x1 conv (3C -> C), stored as three (C, C) slices of the (3C, C) matrix
    bound = 1.0 / jnp.sqrt(3 * C)
    adjw = jax.random.uniform(next(keys), (3 * C, C), jnp.float32, -bound, bound)
    p["adjw1"], p["adjw2"], p["adjw3"] = adjw[:C], adjw[C:2 * C], adjw[2 * C:]
    p["adjb"] = bias(3 * C)
    return p


if __name__ == "__main__":
    # in_channels == out_channels == 16 (divisible by groups=16, as the module
    # requires); W * C == 128 so the packed layout fills one full lane tile.
    N, C, H, W = 2, 16, 8, 8
    key = jax.random.PRNGKey(0)
    kx, kp = jax.random.split(key)
    x_nchw = jax.random.normal(kx, (N, C, H, W), jnp.float32)
    params = make_params(kp, C)

    out = inception_block_forward(x_nchw, params)
    out = jax.block_until_ready(out)

    # cross-check against a pure-JAX reference
    x_nhwc = jnp.transpose(x_nchw, (0, 2, 3, 1))
    ref = jnp.transpose(_ref_forward_nhwc(x_nhwc, params), (0, 3, 1, 2))
    assert out.shape == (N, C, H, W)
    # Tolerance 1e-2: the fused adjust matmul runs at default MXU precision
    # (bf16 input rounding, f32 accumulation) per the perf guidance; worst-case
    # rounding error at these magnitudes is a few 1e-3, structural bugs are
    # O(0.1-1) and would still be caught.
    assert jnp.allclose(out, ref, atol=1e-2, rtol=1e-2), (
        float(jnp.max(jnp.abs(out - ref))))

    print("KERNEL_OK")
</pallas_src>

<mosaic_0001>
module attributes {stable_mosaic.version = 11 : i64} {
  func.func @kernel(%arg0: memref<16x128xf32, #tpu.memory_space<vmem>>, %arg1: memref<55x128xf32, #tpu.memory_space<vmem>>, %arg2: memref<384x128xf32, #tpu.memory_space<vmem>>, %arg3: memref<16x128xf32, #tpu.memory_space<vmem>>) attributes {dimension_semantics = [], scalar_prefetch = 0 : i64, scratch_operands = 0 : i64, tpu.core_type = #tpu.core_type<tc>} {
    %c0 = arith.constant 0 : index
    %c0_0 = arith.constant 0 : index
    %0 = vector.load %arg0[%c0, %c0_0] : memref<16x128xf32, #tpu.memory_space<vmem>>, vector<16x128xf32>
    %1 = tpu.iota {dimensions = array<i32: 0>} : vector<16x128xi32>
    %c7_i32 = arith.constant 7 : i32
    %2 = vector.broadcast %c7_i32 : i32 to vector<16x128xi32>
    %3 = arith.andi %1, %2 : vector<16x128xi32>
    %c-3_i32 = arith.constant -3 : i32
    %4 = vector.broadcast %c-3_i32 : i32 to vector<16x128xi32>
    %5 = arith.addi %3, %4 : vector<16x128xi32>
    %c0_i32 = arith.constant 0 : i32
    %6 = vector.broadcast %c0_i32 : i32 to vector<16x128xi32>
    %7 = arith.cmpi sge, %5, %6 : vector<16x128xi32>
    %c-3_i32_1 = arith.constant -3 : i32
    %8 = vector.broadcast %c-3_i32_1 : i32 to vector<16x128xi32>
    %9 = arith.addi %3, %8 : vector<16x128xi32>
    %c8_i32 = arith.constant 8 : i32
    %10 = vector.broadcast %c8_i32 : i32 to vector<16x128xi32>
    %11 = arith.cmpi slt, %9, %10 : vector<16x128xi32>
    %12 = arith.andi %7, %11 : vector<16x128xi1>
    %13 = arith.extui %12 : vector<16x128xi1> to vector<16x128xi32>
    %14 = arith.sitofp %13 : vector<16x128xi32> to vector<16x128xf32>
    %c-2_i32 = arith.constant -2 : i32
    %15 = vector.broadcast %c-2_i32 : i32 to vector<16x128xi32>
    %16 = arith.addi %3, %15 : vector<16x128xi32>
    %c0_i32_2 = arith.constant 0 : i32
    %17 = vector.broadcast %c0_i32_2 : i32 to vector<16x128xi32>
    %18 = arith.cmpi sge, %16, %17 : vector<16x128xi32>
    %c-2_i32_3 = arith.constant -2 : i32
    %19 = vector.broadcast %c-2_i32_3 : i32 to vector<16x128xi32>
    %20 = arith.addi %3, %19 : vector<16x128xi32>
    %c8_i32_4 = arith.constant 8 : i32
    %21 = vector.broadcast %c8_i32_4 : i32 to vector<16x128xi32>
    %22 = arith.cmpi slt, %20, %21 : vector<16x128xi32>
    %23 = arith.andi %18, %22 : vector<16x128xi1>
    %24 = arith.extui %23 : vector<16x128xi1> to vector<16x128xi32>
    %25 = arith.sitofp %24 : vector<16x128xi32> to vector<16x128xf32>
    %c-1_i32 = arith.constant -1 : i32
    %26 = vector.broadcast %c-1_i32 : i32 to vector<16x128xi32>
    %27 = arith.addi %3, %26 : vector<16x128xi32>
    %c0_i32_5 = arith.constant 0 : i32
    %28 = vector.broadcast %c0_i32_5 : i32 to vector<16x128xi32>
    %29 = arith.cmpi sge, %27, %28 : vector<16x128xi32>
    %c-1_i32_6 = arith.constant -1 : i32
    %30 = vector.broadcast %c-1_i32_6 : i32 to vector<16x128xi32>
    %31 = arith.addi %3, %30 : vector<16x128xi32>
    %c8_i32_7 = arith.constant 8 : i32
    %32 = vector.broadcast %c8_i32_7 : i32 to vector<16x128xi32>
    %33 = arith.cmpi slt, %31, %32 : vector<16x128xi32>
    %34 = arith.andi %29, %33 : vector<16x128xi1>
    %35 = arith.extui %34 : vector<16x128xi1> to vector<16x128xi32>
    %36 = arith.sitofp %35 : vector<16x128xi32> to vector<16x128xf32>
    %c1_i32 = arith.constant 1 : i32
    %37 = vector.broadcast %c1_i32 : i32 to vector<16x128xi32>
    %38 = arith.addi %3, %37 : vector<16x128xi32>
    %c0_i32_8 = arith.constant 0 : i32
    %39 = vector.broadcast %c0_i32_8 : i32 to vector<16x128xi32>
    %40 = arith.cmpi sge, %38, %39 : vector<16x128xi32>
    %c1_i32_9 = arith.constant 1 : i32
    %41 = vector.broadcast %c1_i32_9 : i32 to vector<16x128xi32>
    %42 = arith.addi %3, %41 : vector<16x128xi32>
    %c8_i32_10 = arith.constant 8 : i32
    %43 = vector.broadcast %c8_i32_10 : i32 to vector<16x128xi32>
    %44 = arith.cmpi slt, %42, %43 : vector<16x128xi32>
    %45 = arith.andi %40, %44 : vector<16x128xi1>
    %46 = arith.extui %45 : vector<16x128xi1> to vector<16x128xi32>
    %47 = arith.sitofp %46 : vector<16x128xi32> to vector<16x128xf32>
    %c2_i32 = arith.constant 2 : i32
    %48 = vector.broadcast %c2_i32 : i32 to vector<16x128xi32>
    %49 = arith.addi %3, %48 : vector<16x128xi32>
    %c0_i32_11 = arith.constant 0 : i32
    %50 = vector.broadcast %c0_i32_11 : i32 to vector<16x128xi32>
    %51 = arith.cmpi sge, %49, %50 : vector<16x128xi32>
    %c2_i32_12 = arith.constant 2 : i32
    %52 = vector.broadcast %c2_i32_12 : i32 to vector<16x128xi32>
    %53 = arith.addi %3, %52 : vector<16x128xi32>
    %c8_i32_13 = arith.constant 8 : i32
    %54 = vector.broadcast %c8_i32_13 : i32 to vector<16x128xi32>
    %55 = arith.cmpi slt, %53, %54 : vector<16x128xi32>
    %56 = arith.andi %51, %55 : vector<16x128xi1>
    %57 = arith.extui %56 : vector<16x128xi1> to vector<16x128xi32>
    %58 = arith.sitofp %57 : vector<16x128xi32> to vector<16x128xf32>
    %c3_i32 = arith.constant 3 : i32
    %59 = vector.broadcast %c3_i32 : i32 to vector<16x128xi32>
    %60 = arith.addi %3, %59 : vector<16x128xi32>
    %c0_i32_14 = arith.constant 0 : i32
    %61 = vector.broadcast %c0_i32_14 : i32 to vector<16x128xi32>
    %62 = arith.cmpi sge, %60, %61 : vector<16x128xi32>
    %c3_i32_15 = arith.constant 3 : i32
    %63 = vector.broadcast %c3_i32_15 : i32 to vector<16x128xi32>
    %64 = arith.addi %3, %63 : vector<16x128xi32>
    %c8_i32_16 = arith.constant 8 : i32
    %65 = vector.broadcast %c8_i32_16 : i32 to vector<16x128xi32>
    %66 = arith.cmpi slt, %64, %65 : vector<16x128xi32>
    %67 = arith.andi %62, %66 : vector<16x128xi1>
    %68 = arith.extui %67 : vector<16x128xi1> to vector<16x128xi32>
    %69 = arith.sitofp %68 : vector<16x128xi32> to vector<16x128xf32>
    %cst = arith.constant 0.000000e+00 : f32
    %70 = vector.broadcast %cst : f32 to vector<1x128xf32>
    %71 = vector.extract_strided_slice %0 {offsets = [0, 0], sizes = [15, 128], strides = [1, 1]} : vector<16x128xf32> to vector<15x128xf32>
    %72 = tpu.concatenate %70, %71 in 0 : vector<1x128xf32>, vector<15x128xf32> -> vector<16x128xf32>
    %73 = arith.mulf %72, %36 : vector<16x128xf32>
    %cst_17 = arith.constant 0.000000e+00 : f32
    %74 = vector.broadcast %cst_17 : f32 to vector<16x16xf32>
    %75 = vector.extract_strided_slice %73 {offsets = [0, 0], sizes = [16, 112], strides = [1, 1]} : vector<16x128xf32> to vector<16x112xf32>
    %76 = tpu.concatenate %74, %75 in 1 : vector<16x16xf32>, vector<16x112xf32> -> vector<16x128xf32>
    %c0_18 = arith.constant 0 : index
    %c0_19 = arith.constant 0 : index
    %77 = vector.load %arg1[%c0_18, %c0_19] : memref<55x128xf32, #tpu.memory_space<vmem>>, vector<1x128xf32>
    %78 = vector.broadcast %77 : vector<1x128xf32> to vector<16x128xf32>
    %79 = arith.mulf %76, %78 : vector<16x128xf32>
    %c1 = arith.constant 1 : index
    %c0_20 = arith.constant 0 : index
    %80 = vector.load %arg1[%c1, %c0_20] : memref<55x128xf32, #tpu.memory_space<vmem>>, vector<1x128xf32>
    %81 = vector.broadcast %80 : vector<1x128xf32> to vector<16x128xf32>
    %82 = arith.mulf %73, %81 : vector<16x128xf32>
    %83 = arith.addf %79, %82 : vector<16x128xf32>
    %cst_21 = arith.constant 0.000000e+00 : f32
    %84 = vector.broadcast %cst_21 : f32 to vector<16x16xf32>
    %85 = vector.extract_strided_slice %73 {offsets = [0, 16], sizes = [16, 112], strides = [1, 1]} : vector<16x128xf32> to vector<16x112xf32>
    %86 = tpu.concatenate %85, %84 in 1 : vector<16x112xf32>, vector<16x16xf32> -> vector<16x128xf32>
    %c2 = arith.constant 2 : index
    %c0_22 = arith.constant 0 : index
    %87 = vector.load %arg1[%c2, %c0_22] : memref<55x128xf32, #tpu.memory_space<vmem>>, vector<1x128xf32>
    %88 = vector.broadcast %87 : vector<1x128xf32> to vector<16x128xf32>
    %89 = arith.mulf %86, %88 : vector<16x128xf32>
    %90 = arith.addf %83, %89 : vector<16x128xf32>
    %cst_23 = arith.constant 0.000000e+00 : f32
    %91 = vector.broadcast %cst_23 : f32 to vector<16x16xf32>
    %92 = vector.extract_strided_slice %0 {offsets = [0, 0], sizes = [16, 112], strides = [1, 1]} : vector<16x128xf32> to vector<16x112xf32>
    %93 = tpu.concatenate %91, %92 in 1 : vector<16x16xf32>, vector<16x112xf32> -> vector<16x128xf32>
    %c3 = arith.constant 3 : index
    %c0_24 = arith.constant 0 : index
    %94 = vector.load %arg1[%c3, %c0_24] : memref<55x128xf32, #tpu.memory_space<vmem>>, vector<1x128xf32>
    %95 = vector.broadcast %94 : vector<1x128xf32> to vector<16x128xf32>
    %96 = arith.mulf %93, %95 : vector<16x128xf32>
    %97 = arith.addf %90, %96 : vector<16x128xf32>
    %c4 = arith.constant 4 : index
    %c0_25 = arith.constant 0 : index
    %98 = vector.load %arg1[%c4, %c0_25] : memref<55x128xf32, #tpu.memory_space<vmem>>, vector<1x128xf32>
    %99 = vector.broadcast %98 : vector<1x128xf32> to vector<16x128xf32>
    %100 = arith.mulf %0, %99 : vector<16x128xf32>
    %101 = arith.addf %97, %100 : vector<16x128xf32>
    %cst_26 = arith.constant 0.000000e+00 : f32
    %102 = vector.broadcast %cst_26 : f32 to vector<16x16xf32>
    %103 = vector.extract_strided_slice %0 {offsets = [0, 16], sizes = [16, 112], strides = [1, 1]} : vector<16x128xf32> to vector<16x112xf32>
    %104 = tpu.concatenate %103, %102 in 1 : vector<16x112xf32>, vector<16x16xf32> -> vector<16x128xf32>
    %c5 = arith.constant 5 : index
    %c0_27 = arith.constant 0 : index
    %105 = vector.load %arg1[%c5, %c0_27] : memref<55x128xf32, #tpu.memory_space<vmem>>, vector<1x128xf32>
    %106 = vector.broadcast %105 : vector<1x128xf32> to vector<16x128xf32>
    %107 = arith.mulf %104, %106 : vector<16x128xf32>
    %108 = arith.addf %101, %107 : vector<16x128xf32>
    %cst_28 = arith.constant 0.000000e+00 : f32
    %109 = vector.broadcast %cst_28 : f32 to vector<1x128xf32>
    %110 = vector.extract_strided_slice %0 {offsets = [1, 0], sizes = [15, 128], strides = [1, 1]} : vector<16x128xf32> to vector<15x128xf32>
    %111 = tpu.concatenate %110, %109 in 0 : vector<15x128xf32>, vector<1x128xf32> -> vector<16x128xf32>
    %112 = arith.mulf %111, %47 : vector<16x128xf32>
    %cst_29 = arith.constant 0.000000e+00 : f32
    %113 = vector.broadcast %cst_29 : f32 to vector<16x16xf32>
    %114 = vector.extract_strided_slice %112 {offsets = [0, 0], sizes = [16, 112], strides = [1, 1]} : vector<16x128xf32> to vector<16x112xf32>
    %115 = tpu.concatenate %113, %114 in 1 : vector<16x16xf32>, vector<16x112xf32> -> vector<16x128xf32>
    %c6 = arith.constant 6 : index
    %c0_30 = arith.constant 0 : index
    %116 = vector.load %arg1[%c6, %c0_30] : memref<55x128xf32, #tpu.memory_space<vmem>>, vector<1x128xf32>
    %117 = vector.broadcast %116 : vector<1x128xf32> to vector<16x128xf32>
    %118 = arith.mulf %115, %117 : vector<16x128xf32>
    %119 = arith.addf %108, %118 : vector<16x128xf32>
    %c7 = arith.constant 7 : index
    %c0_31 = arith.constant 0 : index
    %120 = vector.load %arg1[%c7, %c0_31] : memref<55x128xf32, #tpu.memory_space<vmem>>, vector<1x128xf32>
    %121 = vector.broadcast %120 : vector<1x128xf32> to vector<16x128xf32>
    %122 = arith.mulf %112, %121 : vector<16x128xf32>
    %123 = arith.addf %119, %122 : vector<16x128xf32>
    %cst_32 = arith.constant 0.000000e+00 : f32
    %124 = vector.broadcast %cst_32 : f32 to vector<16x16xf32>
    %125 = vector.extract_strided_slice %112 {offsets = [0, 16], sizes = [16, 112], strides = [1, 1]} : vector<16x128xf32> to vector<16x112xf32>
    %126 = tpu.concatenate %125, %124 in 1 : vector<16x112xf32>, vector<16x16xf32> -> vector<16x128xf32>
    %c8 = arith.constant 8 : index
    %c0_33 = arith.constant 0 : index
    %127 = vector.load %arg1[%c8, %c0_33] : memref<55x128xf32, #tpu.memory_space<vmem>>, vector<1x128xf32>
    %128 = vector.broadcast %127 : vector<1x128xf32> to vector<16x128xf32>
    %129 = arith.mulf %126, %128 : vector<16x128xf32>
    %130 = arith.addf %123, %129 : vector<16x128xf32>
    %c39 = arith.constant 39 : index
    %c0_34 = arith.constant 0 : index
    %131 = vector.load %arg1[%c39, %c0_34] : memref<55x128xf32, #tpu.memory_space<vmem>>, vector<1x128xf32>
    %132 = vector.broadcast %131 : vector<1x128xf32> to vector<16x128xf32>
    %133 = arith.addf %130, %132 : vector<16x128xf32>
    %cst_35 = arith.constant dense<0.000000e+00> : vector<128xf32>
    %134 = vector.multi_reduction <add>, %133, %cst_35 [0] : vector<16x128xf32> to vector<128xf32>
    %135 = vector.shape_cast %134 : vector<128xf32> to vector<1x128xf32>
    %136 = arith.mulf %133, %133 : vector<16x128xf32>
    %cst_36 = arith.constant dense<0.000000e+00> : vector<128xf32>
    %137 = vector.multi_reduction <add>, %136, %cst_36 [0] : vector<16x128xf32> to vector<128xf32>
    %138 = vector.shape_cast %137 : vector<128xf32> to vector<1x128xf32>
    %c16_i32 = arith.constant 16 : i32
    %139 = tpu.dynamic_rotate %135 by %c16_i32 dim 1 : vector<1x128xf32>, i32 -> vector<1x128xf32>
    %140 = arith.addf %135, %139 : vector<1x128xf32>
    %c16_i32_37 = arith.constant 16 : i32
    %141 = tpu.dynamic_rotate %138 by %c16_i32_37 dim 1 : vector<1x128xf32>, i32 -> vector<1x128xf32>
    %142 = arith.addf %138, %141 : vector<1x128xf32>
    %c32_i32 = arith.constant 32 : i32
    %143 = tpu.dynamic_rotate %140 by %c32_i32 dim 1 : vector<1x128xf32>, i32 -> vector<1x128xf32>
    %144 = arith.addf %140, %143 : vector<1x128xf32>
    %c32_i32_38 = arith.constant 32 : i32
    %145 = tpu.dynamic_rotate %142 by %c32_i32_38 dim 1 : vector<1x128xf32>, i32 -> vector<1x128xf32>
    %146 = arith.addf %142, %145 : vector<1x128xf32>
    %c64_i32 = arith.constant 64 : i32
    %147 = tpu.dynamic_rotate %144 by %c64_i32 dim 1 : vector<1x128xf32>, i32 -> vector<1x128xf32>
    %148 = arith.addf %144, %147 : vector<1x128xf32>
    %c64_i32_39 = arith.constant 64 : i32
    %149 = tpu.dynamic_rotate %146 by %c64_i32_39 dim 1 : vector<1x128xf32>, i32 -> vector<1x128xf32>
    %150 = arith.addf %146, %149 : vector<1x128xf32>
    %cst_40 = arith.constant 7.812500e-03 : f32
    %151 = vector.broadcast %cst_40 : f32 to vector<1x128xf32>
    %152 = arith.mulf %148, %151 : vector<1x128xf32>
    %cst_41 = arith.constant 7.812500e-03 : f32
    %153 = vector.broadcast %cst_41 : f32 to vector<1x128xf32>
    %154 = arith.mulf %150, %153 : vector<1x128xf32>
    %155 = arith.mulf %152, %152 : vector<1x128xf32>
    %156 = arith.subf %154, %155 : vector<1x128xf32>
    %c46 = arith.constant 46 : index
    %c0_42 = arith.constant 0 : index
    %157 = vector.load %arg1[%c46, %c0_42] : memref<55x128xf32, #tpu.memory_space<vmem>>, vector<1x128xf32>
    %cst_43 = arith.constant 9.99999974E-6 : f32
    %158 = vector.broadcast %cst_43 : f32 to vector<1x128xf32>
    %159 = arith.addf %156, %158 : vector<1x128xf32>
    %160 = math.rsqrt %159 : vector<1x128xf32>
    %161 = arith.mulf %157, %160 : vector<1x128xf32>
    %c47 = arith.constant 47 : index
    %c0_44 = arith.constant 0 : index
    %162 = vector.load %arg1[%c47, %c0_44] : memref<55x128xf32, #tpu.memory_space<vmem>>, vector<1x128xf32>
    %163 = arith.mulf %152, %161 : vector<1x128xf32>
    %164 = arith.subf %162, %163 : vector<1x128xf32>
    %165 = vector.broadcast %161 : vector<1x128xf32> to vector<16x128xf32>
    %166 = arith.mulf %133, %165 : vector<16x128xf32>
    %167 = vector.broadcast %164 : vector<1x128xf32> to vector<16x128xf32>
    %168 = arith.addf %166, %167 : vector<16x128xf32>
    %cst_45 = arith.constant 0.000000e+00 : f32
    %169 = vector.broadcast %cst_45 : f32 to vector<16x128xf32>
    %170 = arith.maximumf %168, %169 : vector<16x128xf32>
    %cst_46 = arith.constant 0.000000e+00 : f32
    %171 = vector.broadcast %cst_46 : f32 to vector<16x16xf32>
    %172 = vector.extract_strided_slice %170 {offsets = [0, 0], sizes = [16, 112], strides = [1, 1]} : vector<16x128xf32> to vector<16x112xf32>
    %173 = tpu.concatenate %171, %172 in 1 : vector<16x16xf32>, vector<16x112xf32> -> vector<16x128xf32>
    %c9 = arith.constant 9 : index
    %c0_47 = arith.constant 0 : index
    %174 = vector.load %arg1[%c9, %c0_47] : memref<55x128xf32, #tpu.memory_space<vmem>>, vector<1x128xf32>
    %175 = vector.broadcast %174 : vector<1x128xf32> to vector<16x128xf32>
    %176 = arith.mulf %173, %175 : vector<16x128xf32>
    %c10 = arith.constant 10 : index
    %c0_48 = arith.constant 0 : index
    %177 = vector.load %arg1[%c10, %c0_48] : memref<55x128xf32, #tpu.memory_space<vmem>>, vector<1x128xf32>
    %178 = vector.broadcast %177 : vector<1x128xf32> to vector<16x128xf32>
    %179 = arith.mulf %170, %178 : vector<16x128xf32>
    %180 = arith.addf %176, %179 : vector<16x128xf32>
    %cst_49 = arith.constant 0.000000e+00 : f32
    %181 = vector.broadcast %cst_49 : f32 to vector<16x16xf32>
    %182 = vector.extract_strided_slice %170 {offsets = [0, 16], sizes = [16, 112], strides = [1, 1]} : vector<16x128xf32> to vector<16x112xf32>
    %183 = tpu.concatenate %182, %181 in 1 : vector<16x112xf32>, vector<16x16xf32> -> vector<16x128xf32>
    %c11 = arith.constant 11 : index
    %c0_50 = arith.constant 0 : index
    %184 = vector.load %arg1[%c11, %c0_50] : memref<55x128xf32, #tpu.memory_space<vmem>>, vector<1x128xf32>
    %185 = vector.broadcast %184 : vector<1x128xf32> to vector<16x128xf32>
    %186 = arith.mulf %183, %185 : vector<16x128xf32>
    %187 = arith.addf %180, %186 : vector<16x128xf32>
    %c40 = arith.constant 40 : index
    %c0_51 = arith.constant 0 : index
    %188 = vector.load %arg1[%c40, %c0_51] : memref<55x128xf32, #tpu.memory_space<vmem>>, vector<1x128xf32>
    %189 = vector.broadcast %188 : vector<1x128xf32> to vector<16x128xf32>
    %190 = arith.addf %187, %189 : vector<16x128xf32>
    %cst_52 = arith.constant 0.000000e+00 : f32
    %191 = vector.broadcast %cst_52 : f32 to vector<1x128xf32>
    %192 = vector.extract_strided_slice %190 {offsets = [0, 0], sizes = [15, 128], strides = [1, 1]} : vector<16x128xf32> to vector<15x128xf32>
    %193 = tpu.concatenate %191, %192 in 0 : vector<1x128xf32>, vector<15x128xf32> -> vector<16x128xf32>
    %194 = arith.mulf %193, %36 : vector<16x128xf32>
    %c12 = arith.constant 12 : index
    %c0_53 = arith.constant 0 : index
    %195 = vector.load %arg1[%c12, %c0_53] : memref<55x128xf32, #tpu.memory_space<vmem>>, vector<1x128xf32>
    %196 = vector.broadcast %195 : vector<1x128xf32> to vector<16x128xf32>
    %197 = arith.mulf %194, %196 : vector<16x128xf32>
    %c13 = arith.constant 13 : index
    %c0_54 = arith.constant 0 : index
    %198 = vector.load %arg1[%c13, %c0_54] : memref<55x128xf32, #tpu.memory_space<vmem>>, vector<1x128xf32>
    %199 = vector.broadcast %198 : vector<1x128xf32> to vector<16x128xf32>
    %200 = arith.mulf %190, %199 : vector<16x128xf32>
    %201 = arith.addf %197, %200 : vector<16x128xf32>
    %cst_55 = arith.constant 0.000000e+00 : f32
    %202 = vector.broadcast %cst_55 : f32 to vector<1x128xf32>
    %203 = vector.extract_strided_slice %190 {offsets = [1, 0], sizes = [15, 128], strides = [1, 1]} : vector<16x128xf32> to vector<15x128xf32>
    %204 = tpu.concatenate %203, %202 in 0 : vector<15x128xf32>, vector<1x128xf32> -> vector<16x128xf32>
    %205 = arith.mulf %204, %47 : vector<16x128xf32>
    %c14 = arith.constant 14 : index
    %c0_56 = arith.constant 0 : index
    %206 = vector.load %arg1[%c14, %c0_56] : memref<55x128xf32, #tpu.memory_space<vmem>>, vector<1x128xf32>
    %207 = vector.broadcast %206 : vector<1x128xf32> to vector<16x128xf32>
    %208 = arith.mulf %205, %207 : vector<16x128xf32>
    %209 = arith.addf %201, %208 : vector<16x128xf32>
    %c41 = arith.constant 41 : index
    %c0_57 = arith.constant 0 : index
    %210 = vector.load %arg1[%c41, %c0_57] : memref<55x128xf32, #tpu.memory_space<vmem>>, vector<1x128xf32>
    %211 = vector.broadcast %210 : vector<1x128xf32> to vector<16x128xf32>
    %212 = arith.addf %209, %211 : vector<16x128xf32>
    %cst_58 = arith.constant dense<0.000000e+00> : vector<128xf32>
    %213 = vector.multi_reduction <add>, %212, %cst_58 [0] : vector<16x128xf32> to vector<128xf32>
    %214 = vector.shape_cast %213 : vector<128xf32> to vector<1x128xf32>
    %215 = arith.mulf %212, %212 : vector<16x128xf32>
    %cst_59 = arith.constant dense<0.000000e+00> : vector<128xf32>
    %216 = vector.multi_reduction <add>, %215, %cst_59 [0] : vector<16x128xf32> to vector<128xf32>
    %217 = vector.shape_cast %216 : vector<128xf32> to vector<1x128xf32>
    %c16_i32_60 = arith.constant 16 : i32
    %218 = tpu.dynamic_rotate %214 by %c16_i32_60 dim 1 : vector<1x128xf32>, i32 -> vector<1x128xf32>
    %219 = arith.addf %214, %218 : vector<1x128xf32>
    %c16_i32_61 = arith.constant 16 : i32
    %220 = tpu.dynamic_rotate %217 by %c16_i32_61 dim 1 : vector<1x128xf32>, i32 -> vector<1x128xf32>
    %221 = arith.addf %217, %220 : vector<1x128xf32>
    %c32_i32_62 = arith.constant 32 : i32
    %222 = tpu.dynamic_rotate %219 by %c32_i32_62 dim 1 : vector<1x128xf32>, i32 -> vector<1x128xf32>
    %223 = arith.addf %219, %222 : vector<1x128xf32>
    %c32_i32_63 = arith.constant 32 : i32
    %224 = tpu.dynamic_rotate %221 by %c32_i32_63 dim 1 : vector<1x128xf32>, i32 -> vector<1x128xf32>
    %225 = arith.addf %221, %224 : vector<1x128xf32>
    %c64_i32_64 = arith.constant 64 : i32
    %226 = tpu.dynamic_rotate %223 by %c64_i32_64 dim 1 : vector<1x128xf32>, i32 -> vector<1x128xf32>
    %227 = arith.addf %223, %226 : vector<1x128xf32>
    %c64_i32_65 = arith.constant 64 : i32
    %228 = tpu.dynamic_rotate %225 by %c64_i32_65 dim 1 : vector<1x128xf32>, i32 -> vector<1x128xf32>
    %229 = arith.addf %225, %228 : vector<1x128xf32>
    %cst_66 = arith.constant 7.812500e-03 : f32
    %230 = vector.broadcast %cst_66 : f32 to vector<1x128xf32>
    %231 = arith.mulf %227, %230 : vector<1x128xf32>
    %cst_67 = arith.constant 7.812500e-03 : f32
    %232 = vector.broadcast %cst_67 : f32 to vector<1x128xf32>
    %233 = arith.mulf %229, %232 : vector<1x128xf32>
    %234 = arith.mulf %231, %231 : vector<1x128xf32>
    %235 = arith.subf %233, %234 : vector<1x128xf32>
    %c48 = arith.constant 48 : index
    %c0_68 = arith.constant 0 : index
    %236 = vector.load %arg1[%c48, %c0_68] : memref<55x128xf32, #tpu.memory_space<vmem>>, vector<1x128xf32>
    %cst_69 = arith.constant 9.99999974E-6 : f32
    %237 = vector.broadcast %cst_69 : f32 to vector<1x128xf32>
    %238 = arith.addf %235, %237 : vector<1x128xf32>
    %239 = math.rsqrt %238 : vector<1x128xf32>
    %240 = arith.mulf %236, %239 : vector<1x128xf32>
    %c49 = arith.constant 49 : index
    %c0_70 = arith.constant 0 : index
    %241 = vector.load %arg1[%c49, %c0_70] : memref<55x128xf32, #tpu.memory_space<vmem>>, vector<1x128xf32>
    %242 = arith.mulf %231, %240 : vector<1x128xf32>
    %243 = arith.subf %241, %242 : vector<1x128xf32>
    %244 = vector.broadcast %240 : vector<1x128xf32> to vector<16x128xf32>
    %245 = arith.mulf %212, %244 : vector<16x128xf32>
    %246 = vector.broadcast %243 : vector<1x128xf32> to vector<16x128xf32>
    %247 = arith.addf %245, %246 : vector<16x128xf32>
    %cst_71 = arith.constant 0.000000e+00 : f32
    %248 = vector.broadcast %cst_71 : f32 to vector<16x128xf32>
    %249 = arith.maximumf %247, %248 : vector<16x128xf32>
    %cst_72 = arith.constant 0.000000e+00 : f32
    %250 = vector.broadcast %cst_72 : f32 to vector<16x32xf32>
    %251 = vector.extract_strided_slice %170 {offsets = [0, 0], sizes = [16, 96], strides = [1, 1]} : vector<16x128xf32> to vector<16x96xf32>
    %252 = tpu.concatenate %250, %251 in 1 : vector<16x32xf32>, vector<16x96xf32> -> vector<16x128xf32>
    %c15 = arith.constant 15 : index
    %c0_73 = arith.constant 0 : index
    %253 = vector.load %arg1[%c15, %c0_73] : memref<55x128xf32, #tpu.memory_space<vmem>>, vector<1x128xf32>
    %254 = vector.broadcast %253 : vector<1x128xf32> to vector<16x128xf32>
    %255 = arith.mulf %252, %254 : vector<16x128xf32>
    %cst_74 = arith.constant 0.000000e+00 : f32
    %256 = vector.broadcast %cst_74 : f32 to vector<16x16xf32>
    %257 = vector.extract_strided_slice %170 {offsets = [0, 0], sizes = [16, 112], strides = [1, 1]} : vector<16x128xf32> to vector<16x112xf32>
    %258 = tpu.concatenate %256, %257 in 1 : vector<16x16xf32>, vector<16x112xf32> -> vector<16x128xf32>
    %c16 = arith.constant 16 : index
    %c0_75 = arith.constant 0 : index
    %259 = vector.load %arg1[%c16, %c0_75] : memref<55x128xf32, #tpu.memory_space<vmem>>, vector<1x128xf32>
    %260 = vector.broadcast %259 : vector<1x128xf32> to vector<16x128xf32>
    %261 = arith.mulf %258, %260 : vector<16x128xf32>
    %262 = arith.addf %255, %261 : vector<16x128xf32>
    %c17 = arith.constant 17 : index
    %c0_76 = arith.constant 0 : index
    %263 = vector.load %arg1[%c17, %c0_76] : memref<55x128xf32, #tpu.memory_space<vmem>>, vector<1x128xf32>
    %264 = vector.broadcast %263 : vector<1x128xf32> to vector<16x128xf32>
    %265 = arith.mulf %170, %264 : vector<16x128xf32>
    %266 = arith.addf %262, %265 : vector<16x128xf32>
    %cst_77 = arith.constant 0.000000e+00 : f32
    %267 = vector.broadcast %cst_77 : f32 to vector<16x16xf32>
    %268 = vector.extract_strided_slice %170 {offsets = [0, 16], sizes = [16, 112], strides = [1, 1]} : vector<16x128xf32> to vector<16x112xf32>
    %269 = tpu.concatenate %268, %267 in 1 : vector<16x112xf32>, vector<16x16xf32> -> vector<16x128xf32>
    %c18 = arith.constant 18 : index
    %c0_78 = arith.constant 0 : index
    %270 = vector.load %arg1[%c18, %c0_78] : memref<55x128xf32, #tpu.memory_space<vmem>>, vector<1x128xf32>
    %271 = vector.broadcast %270 : vector<1x128xf32> to vector<16x128xf32>
    %272 = arith.mulf %269, %271 : vector<16x128xf32>
    %273 = arith.addf %266, %272 : vector<16x128xf32>
    %cst_79 = arith.constant 0.000000e+00 : f32
    %274 = vector.broadcast %cst_79 : f32 to vector<16x32xf32>
    %275 = vector.extract_strided_slice %170 {offsets = [0, 32], sizes = [16, 96], strides = [1, 1]} : vector<16x128xf32> to vector<16x96xf32>
    %276 = tpu.concatenate %275, %274 in 1 : vector<16x96xf32>, vector<16x32xf32> -> vector<16x128xf32>
    %c19 = arith.constant 19 : index
    %c0_80 = arith.constant 0 : index
    %277 = vector.load %arg1[%c19, %c0_80] : memref<55x128xf32, #tpu.memory_space<vmem>>, vector<1x128xf32>
    %278 = vector.broadcast %277 : vector<1x128xf32> to vector<16x128xf32>
    %279 = arith.mulf %276, %278 : vector<16x128xf32>
    %280 = arith.addf %273, %279 : vector<16x128xf32>
    %c42 = arith.constant 42 : index
    %c0_81 = arith.constant 0 : index
    %281 = vector.load %arg1[%c42, %c0_81] : memref<55x128xf32, #tpu.memory_space<vmem>>, vector<1x128xf32>
    %282 = vector.broadcast %281 : vector<1x128xf32> to vector<16x128xf32>
    %283 = arith.addf %280, %282 : vector<16x128xf32>
    %cst_82 = arith.constant 0.000000e+00 : f32
    %284 = vector.broadcast %cst_82 : f32 to vector<2x128xf32>
    %285 = vector.extract_strided_slice %283 {offsets = [0, 0], sizes = [14, 128], strides = [1, 1]} : vector<16x128xf32> to vector<14x128xf32>
    %286 = tpu.concatenate %284, %285 in 0 : vector<2x128xf32>, vector<14x128xf32> -> vector<16x128xf32>
    %287 = arith.mulf %286, %25 : vector<16x128xf32>
    %c20 = arith.constant 20 : index
    %c0_83 = arith.constant 0 : index
    %288 = vector.load %arg1[%c20, %c0_83] : memref<55x128xf32, #tpu.memory_space<vmem>>, vector<1x128xf32>
    %289 = vector.broadcast %288 : vector<1x128xf32> to vector<16x128xf32>
    %290 = arith.mulf %287, %289 : vector<16x128xf32>
    %cst_84 = arith.constant 0.000000e+00 : f32
    %291 = vector.broadcast %cst_84 : f32 to vector<1x128xf32>
    %292 = vector.extract_strided_slice %283 {offsets = [0, 0], sizes = [15, 128], strides = [1, 1]} : vector<16x128xf32> to vector<15x128xf32>
    %293 = tpu.concatenate %291, %292 in 0 : vector<1x128xf32>, vector<15x128xf32> -> vector<16x128xf32>
    %294 = arith.mulf %293, %36 : vector<16x128xf32>
    %c21 = arith.constant 21 : index
    %c0_85 = arith.constant 0 : index
    %295 = vector.load %arg1[%c21, %c0_85] : memref<55x128xf32, #tpu.memory_space<vmem>>, vector<1x128xf32>
    %296 = vector.broadcast %295 : vector<1x128xf32> to vector<16x128xf32>
    %297 = arith.mulf %294, %296 : vector<16x128xf32>
    %298 = arith.addf %290, %297 : vector<16x128xf32>
    %c22 = arith.constant 22 : index
    %c0_86 = arith.constant 0 : index
    %299 = vector.load %arg1[%c22, %c0_86] : memref<55x128xf32, #tpu.memory_space<vmem>>, vector<1x128xf32>
    %300 = vector.broadcast %299 : vector<1x128xf32> to vector<16x128xf32>
    %301 = arith.mulf %283, %300 : vector<16x128xf32>
    %302 = arith.addf %298, %301 : vector<16x128xf32>
    %cst_87 = arith.constant 0.000000e+00 : f32
    %303 = vector.broadcast %cst_87 : f32 to vector<1x128xf32>
    %304 = vector.extract_strided_slice %283 {offsets = [1, 0], sizes = [15, 128], strides = [1, 1]} : vector<16x128xf32> to vector<15x128xf32>
    %305 = tpu.concatenate %304, %303 in 0 : vector<15x128xf32>, vector<1x128xf32> -> vector<16x128xf32>
    %306 = arith.mulf %305, %47 : vector<16x128xf32>
    %c23 = arith.constant 23 : index
    %c0_88 = arith.constant 0 : index
    %307 = vector.load %arg1[%c23, %c0_88] : memref<55x128xf32, #tpu.memory_space<vmem>>, vector<1x128xf32>
    %308 = vector.broadcast %307 : vector<1x128xf32> to vector<16x128xf32>
    %309 = arith.mulf %306, %308 : vector<16x128xf32>
    %310 = arith.addf %302, %309 : vector<16x128xf32>
    %cst_89 = arith.constant 0.000000e+00 : f32
    %311 = vector.broadcast %cst_89 : f32 to vector<2x128xf32>
    %312 = vector.extract_strided_slice %283 {offsets = [2, 0], sizes = [14, 128], strides = [1, 1]} : vector<16x128xf32> to vector<14x128xf32>
    %313 = tpu.concatenate %312, %311 in 0 : vector<14x128xf32>, vector<2x128xf32> -> vector<16x128xf32>
    %314 = arith.mulf %313, %58 : vector<16x128xf32>
    %c24 = arith.constant 24 : index
    %c0_90 = arith.constant 0 : index
    %315 = vector.load %arg1[%c24, %c0_90] : memref<55x128xf32, #tpu.memory_space<vmem>>, vector<1x128xf32>
    %316 = vector.broadcast %315 : vector<1x128xf32> to vector<16x128xf32>
    %317 = arith.mulf %314, %316 : vector<16x128xf32>
    %318 = arith.addf %310, %317 : vector<16x128xf32>
    %c43 = arith.constant 43 : index
    %c0_91 = arith.constant 0 : index
    %319 = vector.load %arg1[%c43, %c0_91] : memref<55x128xf32, #tpu.memory_space<vmem>>, vector<1x128xf32>
    %320 = vector.broadcast %319 : vector<1x128xf32> to vector<16x128xf32>
    %321 = arith.addf %318, %320 : vector<16x128xf32>
    %cst_92 = arith.constant dense<0.000000e+00> : vector<128xf32>
    %322 = vector.multi_reduction <add>, %321, %cst_92 [0] : vector<16x128xf32> to vector<128xf32>
    %323 = vector.shape_cast %322 : vector<128xf32> to vector<1x128xf32>
    %324 = arith.mulf %321, %321 : vector<16x128xf32>
    %cst_93 = arith.constant dense<0.000000e+00> : vector<128xf32>
    %325 = vector.multi_reduction <add>, %324, %cst_93 [0] : vector<16x128xf32> to vector<128xf32>
    %326 = vector.shape_cast %325 : vector<128xf32> to vector<1x128xf32>
    %c16_i32_94 = arith.constant 16 : i32
    %327 = tpu.dynamic_rotate %323 by %c16_i32_94 dim 1 : vector<1x128xf32>, i32 -> vector<1x128xf32>
    %328 = arith.addf %323, %327 : vector<1x128xf32>
    %c16_i32_95 = arith.constant 16 : i32
    %329 = tpu.dynamic_rotate %326 by %c16_i32_95 dim 1 : vector<1x128xf32>, i32 -> vector<1x128xf32>
    %330 = arith.addf %326, %329 : vector<1x128xf32>
    %c32_i32_96 = arith.constant 32 : i32
    %331 = tpu.dynamic_rotate %328 by %c32_i32_96 dim 1 : vector<1x128xf32>, i32 -> vector<1x128xf32>
    %332 = arith.addf %328, %331 : vector<1x128xf32>
    %c32_i32_97 = arith.constant 32 : i32
    %333 = tpu.dynamic_rotate %330 by %c32_i32_97 dim 1 : vector<1x128xf32>, i32 -> vector<1x128xf32>
    %334 = arith.addf %330, %333 : vector<1x128xf32>
    %c64_i32_98 = arith.constant 64 : i32
    %335 = tpu.dynamic_rotate %332 by %c64_i32_98 dim 1 : vector<1x128xf32>, i32 -> vector<1x128xf32>
    %336 = arith.addf %332, %335 : vector<1x128xf32>
    %c64_i32_99 = arith.constant 64 : i32
    %337 = tpu.dynamic_rotate %334 by %c64_i32_99 dim 1 : vector<1x128xf32>, i32 -> vector<1x128xf32>
    %338 = arith.addf %334, %337 : vector<1x128xf32>
    %cst_100 = arith.constant 7.812500e-03 : f32
    %339 = vector.broadcast %cst_100 : f32 to vector<1x128xf32>
    %340 = arith.mulf %336, %339 : vector<1x128xf32>
    %cst_101 = arith.constant 7.812500e-03 : f32
    %341 = vector.broadcast %cst_101 : f32 to vector<1x128xf32>
    %342 = arith.mulf %338, %341 : vector<1x128xf32>
    %343 = arith.mulf %340, %340 : vector<1x128xf32>
    %344 = arith.subf %342, %343 : vector<1x128xf32>
    %c50 = arith.constant 50 : index
    %c0_102 = arith.constant 0 : index
    %345 = vector.load %arg1[%c50, %c0_102] : memref<55x128xf32, #tpu.memory_space<vmem>>, vector<1x128xf32>
    %cst_103 = arith.constant 9.99999974E-6 : f32
    %346 = vector.broadcast %cst_103 : f32 to vector<1x128xf32>
    %347 = arith.addf %344, %346 : vector<1x128xf32>
    %348 = math.rsqrt %347 : vector<1x128xf32>
    %349 = arith.mulf %345, %348 : vector<1x128xf32>
    %c51 = arith.constant 51 : index
    %c0_104 = arith.constant 0 : index
    %350 = vector.load %arg1[%c51, %c0_104] : memref<55x128xf32, #tpu.memory_space<vmem>>, vector<1x128xf32>
    %351 = arith.mulf %340, %349 : vector<1x128xf32>
    %352 = arith.subf %350, %351 : vector<1x128xf32>
    %353 = vector.broadcast %349 : vector<1x128xf32> to vector<16x128xf32>
    %354 = arith.mulf %321, %353 : vector<16x128xf32>
    %355 = vector.broadcast %352 : vector<1x128xf32> to vector<16x128xf32>
    %356 = arith.addf %354, %355 : vector<16x128xf32>
    %cst_105 = arith.constant 0.000000e+00 : f32
    %357 = vector.broadcast %cst_105 : f32 to vector<16x128xf32>
    %358 = arith.maximumf %356, %357 : vector<16x128xf32>
    %cst_106 = arith.constant 0.000000e+00 : f32
    %359 = vector.broadcast %cst_106 : f32 to vector<16x48xf32>
    %360 = vector.extract_strided_slice %170 {offsets = [0, 0], sizes = [16, 80], strides = [1, 1]} : vector<16x128xf32> to vector<16x80xf32>
    %361 = tpu.concatenate %359, %360 in 1 : vector<16x48xf32>, vector<16x80xf32> -> vector<16x128xf32>
    %c25 = arith.constant 25 : index
    %c0_107 = arith.constant 0 : index
    %362 = vector.load %arg1[%c25, %c0_107] : memref<55x128xf32, #tpu.memory_space<vmem>>, vector<1x128xf32>
    %363 = vector.broadcast %362 : vector<1x128xf32> to vector<16x128xf32>
    %364 = arith.mulf %361, %363 : vector<16x128xf32>
    %cst_108 = arith.constant 0.000000e+00 : f32
    %365 = vector.broadcast %cst_108 : f32 to vector<16x32xf32>
    %366 = vector.extract_strided_slice %170 {offsets = [0, 0], sizes = [16, 96], strides = [1, 1]} : vector<16x128xf32> to vector<16x96xf32>
    %367 = tpu.concatenate %365, %366 in 1 : vector<16x32xf32>, vector<16x96xf32> -> vector<16x128xf32>
    %c26 = arith.constant 26 : index
    %c0_109 = arith.constant 0 : index
    %368 = vector.load %arg1[%c26, %c0_109] : memref<55x128xf32, #tpu.memory_space<vmem>>, vector<1x128xf32>
    %369 = vector.broadcast %368 : vector<1x128xf32> to vector<16x128xf32>
    %370 = arith.mulf %367, %369 : vector<16x128xf32>
    %371 = arith.addf %364, %370 : vector<16x128xf32>
    %cst_110 = arith.constant 0.000000e+00 : f32
    %372 = vector.broadcast %cst_110 : f32 to vector<16x16xf32>
    %373 = vector.extract_strided_slice %170 {offsets = [0, 0], sizes = [16, 112], strides = [1, 1]} : vector<16x128xf32> to vector<16x112xf32>
    %374 = tpu.concatenate %372, %373 in 1 : vector<16x16xf32>, vector<16x112xf32> -> vector<16x128xf32>
    %c27 = arith.constant 27 : index
    %c0_111 = arith.constant 0 : index
    %375 = vector.load %arg1[%c27, %c0_111] : memref<55x128xf32, #tpu.memory_space<vmem>>, vector<1x128xf32>
    %376 = vector.broadcast %375 : vector<1x128xf32> to vector<16x128xf32>
    %377 = arith.mulf %374, %376 : vector<16x128xf32>
    %378 = arith.addf %371, %377 : vector<16x128xf32>
    %c28 = arith.constant 28 : index
    %c0_112 = arith.constant 0 : index
    %379 = vector.load %arg1[%c28, %c0_112] : memref<55x128xf32, #tpu.memory_space<vmem>>, vector<1x128xf32>
    %380 = vector.broadcast %379 : vector<1x128xf32> to vector<16x128xf32>
    %381 = arith.mulf %170, %380 : vector<16x128xf32>
    %382 = arith.addf %378, %381 : vector<16x128xf32>
    %cst_113 = arith.constant 0.000000e+00 : f32
    %383 = vector.broadcast %cst_113 : f32 to vector<16x16xf32>
    %384 = vector.extract_strided_slice %170 {offsets = [0, 16], sizes = [16, 112], strides = [1, 1]} : vector<16x128xf32> to vector<16x112xf32>
    %385 = tpu.concatenate %384, %383 in 1 : vector<16x112xf32>, vector<16x16xf32> -> vector<16x128xf32>
    %c29 = arith.constant 29 : index
    %c0_114 = arith.constant 0 : index
    %386 = vector.load %arg1[%c29, %c0_114] : memref<55x128xf32, #tpu.memory_space<vmem>>, vector<1x128xf32>
    %387 = vector.broadcast %386 : vector<1x128xf32> to vector<16x128xf32>
    %388 = arith.mulf %385, %387 : vector<16x128xf32>
    %389 = arith.addf %382, %388 : vector<16x128xf32>
    %cst_115 = arith.constant 0.000000e+00 : f32
    %390 = vector.broadcast %cst_115 : f32 to vector<16x32xf32>
    %391 = vector.extract_strided_slice %170 {offsets = [0, 32], sizes = [16, 96], strides = [1, 1]} : vector<16x128xf32> to vector<16x96xf32>
    %392 = tpu.concatenate %391, %390 in 1 : vector<16x96xf32>, vector<16x32xf32> -> vector<16x128xf32>
    %c30 = arith.constant 30 : index
    %c0_116 = arith.constant 0 : index
    %393 = vector.load %arg1[%c30, %c0_116] : memref<55x128xf32, #tpu.memory_space<vmem>>, vector<1x128xf32>
    %394 = vector.broadcast %393 : vector<1x128xf32> to vector<16x128xf32>
    %395 = arith.mulf %392, %394 : vector<16x128xf32>
    %396 = arith.addf %389, %395 : vector<16x128xf32>
    %cst_117 = arith.constant 0.000000e+00 : f32
    %397 = vector.broadcast %cst_117 : f32 to vector<16x48xf32>
    %398 = vector.extract_strided_slice %170 {offsets = [0, 48], sizes = [16, 80], strides = [1, 1]} : vector<16x128xf32> to vector<16x80xf32>
    %399 = tpu.concatenate %398, %397 in 1 : vector<16x80xf32>, vector<16x48xf32> -> vector<16x128xf32>
    %c31 = arith.constant 31 : index
    %c0_118 = arith.constant 0 : index
    %400 = vector.load %arg1[%c31, %c0_118] : memref<55x128xf32, #tpu.memory_space<vmem>>, vector<1x128xf32>
    %401 = vector.broadcast %400 : vector<1x128xf32> to vector<16x128xf32>
    %402 = arith.mulf %399, %401 : vector<16x128xf32>
    %403 = arith.addf %396, %402 : vector<16x128xf32>
    %c44 = arith.constant 44 : index
    %c0_119 = arith.constant 0 : index
    %404 = vector.load %arg1[%c44, %c0_119] : memref<55x128xf32, #tpu.memory_space<vmem>>, vector<1x128xf32>
    %405 = vector.broadcast %404 : vector<1x128xf32> to vector<16x128xf32>
    %406 = arith.addf %403, %405 : vector<16x128xf32>
    %cst_120 = arith.constant 0.000000e+00 : f32
    %407 = vector.broadcast %cst_120 : f32 to vector<3x128xf32>
    %408 = vector.extract_strided_slice %406 {offsets = [0, 0], sizes = [13, 128], strides = [1, 1]} : vector<16x128xf32> to vector<13x128xf32>
    %409 = tpu.concatenate %407, %408 in 0 : vector<3x128xf32>, vector<13x128xf32> -> vector<16x128xf32>
    %410 = arith.mulf %409, %14 : vector<16x128xf32>
    %c32 = arith.constant 32 : index
    %c0_121 = arith.constant 0 : index
    %411 = vector.load %arg1[%c32, %c0_121] : memref<55x128xf32, #tpu.memory_space<vmem>>, vector<1x128xf32>
    %412 = vector.broadcast %411 : vector<1x128xf32> to vector<16x128xf32>
    %413 = arith.mulf %410, %412 : vector<16x128xf32>
    %cst_122 = arith.constant 0.000000e+00 : f32
    %414 = vector.broadcast %cst_122 : f32 to vector<2x128xf32>
    %415 = vector.extract_strided_slice %406 {offsets = [0, 0], sizes = [14, 128], strides = [1, 1]} : vector<16x128xf32> to vector<14x128xf32>
    %416 = tpu.concatenate %414, %415 in 0 : vector<2x128xf32>, vector<14x128xf32> -> vector<16x128xf32>
    %417 = arith.mulf %416, %25 : vector<16x128xf32>
    %c33 = arith.constant 33 : index
    %c0_123 = arith.constant 0 : index
    %418 = vector.load %arg1[%c33, %c0_123] : memref<55x128xf32, #tpu.memory_space<vmem>>, vector<1x128xf32>
    %419 = vector.broadcast %418 : vector<1x128xf32> to vector<16x128xf32>
    %420 = arith.mulf %417, %419 : vector<16x128xf32>
    %421 = arith.addf %413, %420 : vector<16x128xf32>
    %cst_124 = arith.constant 0.000000e+00 : f32
    %422 = vector.broadcast %cst_124 : f32 to vector<1x128xf32>
    %423 = vector.extract_strided_slice %406 {offsets = [0, 0], sizes = [15, 128], strides = [1, 1]} : vector<16x128xf32> to vector<15x128xf32>
    %424 = tpu.concatenate %422, %423 in 0 : vector<1x128xf32>, vector<15x128xf32> -> vector<16x128xf32>
    %425 = arith.mulf %424, %36 : vector<16x128xf32>
    %c34 = arith.constant 34 : index
    %c0_125 = arith.constant 0 : index
    %426 = vector.load %arg1[%c34, %c0_125] : memref<55x128xf32, #tpu.memory_space<vmem>>, vector<1x128xf32>
    %427 = vector.broadcast %426 : vector<1x128xf32> to vector<16x128xf32>
    %428 = arith.mulf %425, %427 : vector<16x128xf32>
    %429 = arith.addf %421, %428 : vector<16x128xf32>
    %c35 = arith.constant 35 : index
    %c0_126 = arith.constant 0 : index
    %430 = vector.load %arg1[%c35, %c0_126] : memref<55x128xf32, #tpu.memory_space<vmem>>, vector<1x128xf32>
    %431 = vector.broadcast %430 : vector<1x128xf32> to vector<16x128xf32>
    %432 = arith.mulf %406, %431 : vector<16x128xf32>
    %433 = arith.addf %429, %432 : vector<16x128xf32>
    %cst_127 = arith.constant 0.000000e+00 : f32
    %434 = vector.broadcast %cst_127 : f32 to vector<1x128xf32>
    %435 = vector.extract_strided_slice %406 {offsets = [1, 0], sizes = [15, 128], strides = [1, 1]} : vector<16x128xf32> to vector<15x128xf32>
    %436 = tpu.concatenate %435, %434 in 0 : vector<15x128xf32>, vector<1x128xf32> -> vector<16x128xf32>
    %437 = arith.mulf %436, %47 : vector<16x128xf32>
    %c36 = arith.constant 36 : index
    %c0_128 = arith.constant 0 : index
    %438 = vector.load %arg1[%c36, %c0_128] : memref<55x128xf32, #tpu.memory_space<vmem>>, vector<1x128xf32>
    %439 = vector.broadcast %438 : vector<1x128xf32> to vector<16x128xf32>
    %440 = arith.mulf %437, %439 : vector<16x128xf32>
    %441 = arith.addf %433, %440 : vector<16x128xf32>
    %cst_129 = arith.constant 0.000000e+00 : f32
    %442 = vector.broadcast %cst_129 : f32 to vector<2x128xf32>
    %443 = vector.extract_strided_slice %406 {offsets = [2, 0], sizes = [14, 128], strides = [1, 1]} : vector<16x128xf32> to vector<14x128xf32>
    %444 = tpu.concatenate %443, %442 in 0 : vector<14x128xf32>, vector<2x128xf32> -> vector<16x128xf32>
    %445 = arith.mulf %444, %58 : vector<16x128xf32>
    %c37 = arith.constant 37 : index
    %c0_130 = arith.constant 0 : index
    %446 = vector.load %arg1[%c37, %c0_130] : memref<55x128xf32, #tpu.memory_space<vmem>>, vector<1x128xf32>
    %447 = vector.broadcast %446 : vector<1x128xf32> to vector<16x128xf32>
    %448 = arith.mulf %445, %447 : vector<16x128xf32>
    %449 = arith.addf %441, %448 : vector<16x128xf32>
    %cst_131 = arith.constant 0.000000e+00 : f32
    %450 = vector.broadcast %cst_131 : f32 to vector<3x128xf32>
    %451 = vector.extract_strided_slice %406 {offsets = [3, 0], sizes = [13, 128], strides = [1, 1]} : vector<16x128xf32> to vector<13x128xf32>
    %452 = tpu.concatenate %451, %450 in 0 : vector<13x128xf32>, vector<3x128xf32> -> vector<16x128xf32>
    %453 = arith.mulf %452, %69 : vector<16x128xf32>
    %c38 = arith.constant 38 : index
    %c0_132 = arith.constant 0 : index
    %454 = vector.load %arg1[%c38, %c0_132] : memref<55x128xf32, #tpu.memory_space<vmem>>, vector<1x128xf32>
    %455 = vector.broadcast %454 : vector<1x128xf32> to vector<16x128xf32>
    %456 = arith.mulf %453, %455 : vector<16x128xf32>
    %457 = arith.addf %449, %456 : vector<16x128xf32>
    %c45 = arith.constant 45 : index
    %c0_133 = arith.constant 0 : index
    %458 = vector.load %arg1[%c45, %c0_133] : memref<55x128xf32, #tpu.memory_space<vmem>>, vector<1x128xf32>
    %459 = vector.broadcast %458 : vector<1x128xf32> to vector<16x128xf32>
    %460 = arith.addf %457, %459 : vector<16x128xf32>
    %cst_134 = arith.constant dense<0.000000e+00> : vector<128xf32>
    %461 = vector.multi_reduction <add>, %460, %cst_134 [0] : vector<16x128xf32> to vector<128xf32>
    %462 = vector.shape_cast %461 : vector<128xf32> to vector<1x128xf32>
    %463 = arith.mulf %460, %460 : vector<16x128xf32>
    %cst_135 = arith.constant dense<0.000000e+00> : vector<128xf32>
    %464 = vector.multi_reduction <add>, %463, %cst_135 [0] : vector<16x128xf32> to vector<128xf32>
    %465 = vector.shape_cast %464 : vector<128xf32> to vector<1x128xf32>
    %c16_i32_136 = arith.constant 16 : i32
    %466 = tpu.dynamic_rotate %462 by %c16_i32_136 dim 1 : vector<1x128xf32>, i32 -> vector<1x128xf32>
    %467 = arith.addf %462, %466 : vector<1x128xf32>
    %c16_i32_137 = arith.constant 16 : i32
    %468 = tpu.dynamic_rotate %465 by %c16_i32_137 dim 1 : vector<1x128xf32>, i32 -> vector<1x128xf32>
    %469 = arith.addf %465, %468 : vector<1x128xf32>
    %c32_i32_138 = arith.constant 32 : i32
    %470 = tpu.dynamic_rotate %467 by %c32_i32_138 dim 1 : vector<1x128xf32>, i32 -> vector<1x128xf32>
    %471 = arith.addf %467, %470 : vector<1x128xf32>
    %c32_i32_139 = arith.constant 32 : i32
    %472 = tpu.dynamic_rotate %469 by %c32_i32_139 dim 1 : vector<1x128xf32>, i32 -> vector<1x128xf32>
    %473 = arith.addf %469, %472 : vector<1x128xf32>
    %c64_i32_140 = arith.constant 64 : i32
    %474 = tpu.dynamic_rotate %471 by %c64_i32_140 dim 1 : vector<1x128xf32>, i32 -> vector<1x128xf32>
    %475 = arith.addf %471, %474 : vector<1x128xf32>
    %c64_i32_141 = arith.constant 64 : i32
    %476 = tpu.dynamic_rotate %473 by %c64_i32_141 dim 1 : vector<1x128xf32>, i32 -> vector<1x128xf32>
    %477 = arith.addf %473, %476 : vector<1x128xf32>
    %cst_142 = arith.constant 7.812500e-03 : f32
    %478 = vector.broadcast %cst_142 : f32 to vector<1x128xf32>
    %479 = arith.mulf %475, %478 : vector<1x128xf32>
    %cst_143 = arith.constant 7.812500e-03 : f32
    %480 = vector.broadcast %cst_143 : f32 to vector<1x128xf32>
    %481 = arith.mulf %477, %480 : vector<1x128xf32>
    %482 = arith.mulf %479, %479 : vector<1x128xf32>
    %483 = arith.subf %481, %482 : vector<1x128xf32>
    %c52 = arith.constant 52 : index
    %c0_144 = arith.constant 0 : index
    %484 = vector.load %arg1[%c52, %c0_144] : memref<55x128xf32, #tpu.memory_space<vmem>>, vector<1x128xf32>
    %cst_145 = arith.constant 9.99999974E-6 : f32
    %485 = vector.broadcast %cst_145 : f32 to vector<1x128xf32>
    %486 = arith.addf %483, %485 : vector<1x128xf32>
    %487 = math.rsqrt %486 : vector<1x128xf32>
    %488 = arith.mulf %484, %487 : vector<1x128xf32>
    %c53 = arith.constant 53 : index
    %c0_146 = arith.constant 0 : index
    %489 = vector.load %arg1[%c53, %c0_146] : memref<55x128xf32, #tpu.memory_space<vmem>>, vector<1x128xf32>
    %490 = arith.mulf %479, %488 : vector<1x128xf32>
    %491 = arith.subf %489, %490 : vector<1x128xf32>
    %492 = vector.broadcast %488 : vector<1x128xf32> to vector<16x128xf32>
    %493 = arith.mulf %460, %492 : vector<16x128xf32>
    %494 = vector.broadcast %491 : vector<1x128xf32> to vector<16x128xf32>
    %495 = arith.addf %493, %494 : vector<16x128xf32>
    %cst_147 = arith.constant 0.000000e+00 : f32
    %496 = vector.broadcast %cst_147 : f32 to vector<16x128xf32>
    %497 = arith.maximumf %495, %496 : vector<16x128xf32>
    %498 = tpu.concatenate %249, %358, %497 in 1 : vector<16x128xf32>, vector<16x128xf32>, vector<16x128xf32> -> vector<16x384xf32>
    %c0_148 = arith.constant 0 : index
    %c0_149 = arith.constant 0 : index
    %499 = vector.load %arg2[%c0_148, %c0_149] : memref<384x128xf32, #tpu.memory_space<vmem>>, vector<384x128xf32>
    %cst_150 = arith.constant dense<0.000000e+00> : vector<16x128xf32>
    %500 = tpu.matmul %498, %499, %cst_150 {dimension_numbers = #tpu.dot_dimension_numbers<[1], [0], [0], [1], [0, 0, 1, 1], [], []>} : vector<16x384xf32>, vector<384x128xf32>, vector<16x128xf32> -> vector<16x128xf32>
    %c54 = arith.constant 54 : index
    %c0_151 = arith.constant 0 : index
    %501 = vector.load %arg1[%c54, %c0_151] : memref<55x128xf32, #tpu.memory_space<vmem>>, vector<1x128xf32>
    %502 = vector.broadcast %501 : vector<1x128xf32> to vector<16x128xf32>
    %503 = arith.addf %500, %502 : vector<16x128xf32>
    %c0_152 = arith.constant 0 : index
    %c0_153 = arith.constant 0 : index
    %504 = vector.load %arg3[%c0_152, %c0_153] : memref<16x128xf32, #tpu.memory_space<vmem>>, vector<16x128xf32>
    tpu.vector_store %arg3[%c0_152, %c0_153], %503 {strides = array<i32>} : memref<16x128xf32, #tpu.memory_space<vmem>>, vector<16x128xf32>,
    return
  }
}

</mosaic_0001>

<bundles_post_ra>
// kernel: tpu_custom_call.1
= control target key start
LH: loop header
LB: loop body
LE: loop exit
PB: predicated region body
PF: predicated region fallthrough
CT: control target
= control target key end

     0   :  { %8 = vsyncpa [#allocation3], 0  ;;  %s1961_s0 = inlined_call_operand.hbm [shape: f32[16,128], index: 0, kind: input, shape index: {}]   ;;  %s1962_s1 = inlined_call_operand.hbm [shape: f32[55,128], index: 1, kind: input, shape index: {}]   ;;  %s1963_s2 = inlined_call_operand.hbm [shape: f32[384,128], index: 2, kind: input, shape index: {}]   ;;  %s1964_s3 = inlined_call_operand.hbm [shape: f32[16,128], index: 3, kind: output, shape index: {}]  }
   0x1   :  { %9 = vsyncpa [#allocation6], 0 }
   0x2   :  { %10 = vsyncpa [#allocation4], 0  ;;  %s1544_s12 = smov [#allocation5]   ;;  %s1545_s14 = smov [#allocation2]  }
   0x3   :  { %s28_s13 = sshll.u32 %s1544_s12, 4  ;;  %s16_s15 = sshll.u32 %s1545_s14, 4  ;;  %s29_s13 = int_to_ptr.vmem [resolvable:$true] %s28_s13  ;;  %s1578_s15 = int_to_ptr.vmem [resolvable:$true] %s16_s15 }
   0x4   :  { %s1450_s18 = scalar_lea.hbm %s1962_s1, 896 }
   0x5   :  { %p1451_p0 = scmp.ne.s32.totalorder %s1962_s1, %s1450_s18  ;;  %p1454_p1 = scmp.lt.u32.totalorder %s1450_s18, %s1962_s1 }
   0x7   :  { %p1456_p2 = pnand %p1454_p1, %p1451_p0 }
   0x9   :  { %1459 = shalt.err (!%p1456_p2)
}
   0xa   :  { %s1460_s23 = scalar_lea.vmem %s29_s13, 896  ;;  %p1465_p4 = scmp.lt.s32.totalorder %s29_s13, %s29_s13 }
   0xb   :  { %p1461_p3 = scmp.ne.s32.totalorder %s29_s13, %s1460_s23  ;;  %p1466_p5 = scmp.lt.s32.totalorder %s1460_s23, %s1460_s23 }
   0xd   :  { %p1467_p6 = por %p1466_p5, %p1465_p4 }
   0xf   :  { %p1468_p7 = pnand %p1467_p6, %p1461_p3 }
  0x11   :  { %1471 = shalt.err (!%p1468_p7)
}
  0x12   :  { %s1546_s24 = smov 128   ;;  %s1547_s25 = smov 8  }
  0x13   :  { %34 = dma.hbm_to_vmem [thread:$0]  %s1962_s1, 896, %s29_s13, [#allocation6], %s1546_s24, %s1546_s24, %s1547_s25  }
  0x14   :  { %s1472_s30 = scalar_lea.hbm %s1961_s0, 256 }
  0x15   :  { %p1473_p8 = scmp.ne.s32.totalorder %s1961_s0, %s1472_s30  ;;  %p1476_p9 = scmp.lt.u32.totalorder %s1472_s30, %s1961_s0 }
  0x17   :  { %p1478_p10 = pnand %p1476_p9, %p1473_p8 }
  0x19   :  { %1481 = shalt.err (!%p1478_p10)
}
  0x1a   :  { %s1482_s8 = scalar_lea.vmem %s1578_s15, 256  ;;  %p1487_p12 = scmp.lt.s32.totalorder %s1578_s15, %s1578_s15 }
  0x1b   :  { %p1483_p11 = scmp.ne.s32.totalorder %s1578_s15, %s1482_s8  ;;  %p1488_p13 = scmp.lt.s32.totalorder %s1482_s8, %s1482_s8 }
  0x1d   :  { %p1489_p0 = por %p1488_p13, %p1487_p12 }
  0x1f   :  { %p1490_p1 = pnand %p1489_p0, %p1483_p11 }
  0x21   :  { %1493 = shalt.err (!%p1490_p1)
}
  0x22   :  { %22 = dma.hbm_to_vmem [thread:$0]  %s1961_s0, 256, %s1578_s15, [#allocation3], %s1546_s24, %s1546_s24, %s1547_s25  }
  0x23   :  { %s1548_s10 = smov [#allocation7]   ;;  %s1494_s14 = scalar_lea.hbm %s1963_s2, 6144 }
  0x24   :  { %s40_s11 = sshll.u32 %s1548_s10, 4  ;;  %p1495_p2 = scmp.ne.s32.totalorder %s1963_s2, %s1494_s14  ;;  %s41_s11 = int_to_ptr.vmem [resolvable:$true] %s40_s11 }
  0x25   :  { %p1498_p3 = scmp.lt.u32.totalorder %s1494_s14, %s1963_s2 }
  0x27   :  { %p1500_p4 = pnand %p1498_p3, %p1495_p2 }
  0x29   :  { %1503 = shalt.err (!%p1500_p4)
}
  0x2a   :  { %s1504_s20 = scalar_lea.vmem %s41_s11, 6144  ;;  %p1509_p6 = scmp.lt.s32.totalorder %s41_s11, %s41_s11 }
  0x2b   :  { %p1505_p5 = scmp.ne.s32.totalorder %s41_s11, %s1504_s20  ;;  %p1510_p7 = scmp.lt.s32.totalorder %s1504_s20, %s1504_s20 }
  0x2d   :  { %p1511_p8 = por %p1510_p7, %p1509_p6 }
  0x2f   :  { %p1512_p9 = pnand %p1511_p8, %p1505_p5 }
  0x31   :  { %1515 = shalt.err (!%p1512_p9)
}
  0x32   :  { %46 = dma.hbm_to_vmem [thread:$0]  %s1963_s2, 6144, %s41_s11, [#allocation6], %s1546_s24, %s1546_s24, %s1547_s25  }
  0x33   :  { %1538 = dma.done.wait [#allocation3], 256  }
  0x34   :  { %1539 = vsyncadd [#allocation3], 4294967040 }
  0x35   :  { %1540 = dma.done.wait [#allocation6], 7040  }
  0x36   :  { %1541 = vsyncadd [#allocation6], 4294960256  ;;  %v58_v0 = vlaneseq  ;;  %v1639_v6 = vld [vmem:[#allocation2] sm:$0xff]  ;;  %vm137_vm0 = vcmask 1040384   ;;  %v1641_v7 = vld [vmem:[#allocation2 + $0x8] sm:$0xff]  ;;  %v1549_v11 = vmov 0.0  }
  0x37   :  { %v138_v8 = vrot.slane %v1639_v6, 7  ;;  %v139_v10 = vrot.slane %v1641_v7, 7  ;;  %s1550_s2 = smov 112   ;;  %s1551_s21 = smov 16   ;;  %v236_v20 = vrot.slane %v1641_v7, 1  ;;  %v235_v21 = vrot.slane %v1639_v6, 1 }
  0x38   :  { %v1630_v1 = vshrl.u32 %v58_v0, 7  ;;  %vm234_vm4 = vcmask 1046528   ;;  %vm154_vm6 = vcmask 130048   ;;  %v1226_v28 = vld [vmem:[#allocation5] ss:$0 sm:$0xff]  ;;  %vm179_vm7 = vcmask 916480  }
  0x39   :  { %v143_v13 = vsel %vm137_vm0, 0.0, %v138_v8  ;;  %v140_v14 = vsel %vm137_vm0, %v138_v8, %v139_v10  ;;  %v240_v23 = vsel %vm234_vm4, %v236_v20, 0.0  ;;  %v237_v25 = vsel %vm234_vm4, %v235_v21, %v236_v20  ;;  %v1227_v29 = vld [vmem:[#allocation5 + $0x1] ss:$0 sm:$0xff]  ;;  %v1228_v37 = vld [vmem:[#allocation5 + $0x2] ss:$0 sm:$0xff] }
  0x3a   :  { %v1633_v2 = vand.u32 7, %v1630_v1  ;;  %v60_v3 = vadd.s32 8, %v1630_v1  ;;  %v1230_v43 = vld [vmem:[#allocation5 + $0x4] ss:$0 sm:$0xff]  ;;  %v1229_v47 = vld [vmem:[#allocation5 + $0x3] ss:$0 sm:$0xff] }
  0x3b   :  { %v213_v51 = vmul.f32 %v1230_v43, %v1639_v6  ;;  %v1231_v56 = vld [vmem:[#allocation5 + $0x5] ss:$0 sm:$0xff]  ;;  %v214_v60 = vmul.f32 %v1230_v43, %v1641_v7  ;;  %s1552_s22 = smov 32   ;;  %s1553_s23 = smov 64   ;;  %vm519_vm8 = vcmask 261120   ;;  %vm732_vm9 = vcmask 392192  }
  0x3c   :  { %v87_v4 = vadd.s32 4294967295, %v1633_v2  ;;  %v1637_v5 = vand.u32 7, %v60_v3  ;;  %v99_v19 = vadd.s32 1, %v1633_v2  ;;  %s1554_s26 = smov 48   ;;  %s1555_s27 = smov 96   ;;  %vm562_vm15 = vcmask 785408  }
  0x3d   :  { %s1556_s28 = smov 80   ;;  %s1557_s29 = smov [#allocation8]  }
  0x3e   :  { %vm89_vm1 = vcmp.ge.s32.totalorder %v87_v4, 0  ;;  %v88_v9 = vadd.s32 4294967295, %v1637_v5  ;;  %v100_v18 = vadd.s32 1, %v1637_v5  ;;  %vm103_vm5 = vcmp.lt.s32.totalorder %v99_v19, 8  ;;  %s1201_s30 = sshll.u32 %s1557_s29, 4  ;;  %s1202_s30 = int_to_ptr.vmem [resolvable:$true] %s1201_s30 }
  0x3f   :  { %v1647_v12 = vsel %vm89_vm1, 1.0, %v1549_v11  ;;  %v1673_v24 = vsel %vm103_vm5, 1.0, %v1549_v11  ;;  %vm642_vm5 = vcmask 1045504   ;;  %s1516_s4 = scalar_lea.vmem %s1202_s30, 256  ;;  %p1521_p11 = scmp.lt.s32.totalorder %s1202_s30, %s1202_s30 }
  0x40   :  { %vm90_vm2 = vcmp.ge.s32.totalorder %v88_v9, 0  ;;  %v144_v15 = vmul.f32 %v1647_v12, %v143_v13  ;;  %vm104_vm3 = vcmp.lt.s32.totalorder %v100_v18, 8  ;;  %v241_v27 = vmul.f32 %v1673_v24, %v237_v25  ;;  %v1232_v9 = vld [vmem:[#allocation5 + $0x6] ss:$0 sm:$0xff]  ;;  %p1517_p10 = scmp.ne.s32.totalorder %s1202_s30, %s1516_s4  ;;  %p1522_p12 = scmp.lt.s32.totalorder %s1516_s4, %s1516_s4 }
  0x41   :  { %v1653_v16 = vsel %vm90_vm2, 1.0, %v1549_v11  ;;  %v1669_v22 = vsel %vm104_vm3, 1.0, %v1549_v11  ;;  %vm793_vm3 = vcmask 654336  }
  0x42   :  { %173 = vrot.lane.b32.xlu1 %v144_v15, %s1550_s2  ;;  %148 = vrot.lane.b32.xlu0 %v144_v15, %s1551_s21  ;;  %v145_v17 = vmul.f32 %v1653_v16, %v140_v14  ;;  %v242_v26 = vmul.f32 %v1669_v22, %v240_v23  ;;  %v169_v34 = vmul.f32 %v1227_v29, %v144_v15  ;;  %p1523_p13 = por %p1522_p12, %p1521_p11 }
  0x44   :  { %v170_v42 = vmul.f32 %v1227_v29, %v145_v17  ;;  %p1524_p0 = pnand %p1523_p13, %p1517_p10 }
  0x46   :  { %193 = vrot.lane.b32.xlu1 %v1641_v7, %s1551_s21  ;;  %150 = vrot.lane.b32.xlu0 %v145_v17, %s1551_s21 }
  0x4a   :  { %175 = vrot.lane.b32.xlu1 %v145_v17, %s1550_s2  ;;  %191 = vrot.lane.b32.xlu0 %v1639_v6, %s1551_s21 }
  0x4e   :  { %219 = vrot.lane.b32.xlu1 %v1641_v7, %s1550_s2  ;;  %217 = vrot.lane.b32.xlu0 %v1639_v6, %s1550_s2  ;;  %v1233_v6 = vld [vmem:[#allocation5 + $0x7] ss:$0 sm:$0xff] }
  0x4f   :  { %v268_v7 = vmul.f32 %v1233_v6, %v242_v26  ;;  %v267_v19 = vmul.f32 %v1233_v6, %v241_v27 }
  0x52   :  { %247 = vrot.lane.b32.xlu1 %v242_v26, %s1551_s21  ;;  %245 = vrot.lane.b32.xlu0 %v241_v27, %s1551_s21 }
  0x56   :  { %273 = vrot.lane.b32.xlu1 %v242_v26, %s1550_s2  ;;  %271 = vrot.lane.b32.xlu0 %v241_v27, %s1550_s2 }
  0xb4   :  { %v174_v30 = vpop.permute.xlu1 %173  ;;  %v149_v31 = vpop.permute.xlu0 %148 }
  0xb5   :  { %v155_v32 = vsel %vm154_vm6, 0.0, %v149_v31  ;;  %v180_v38 = vsel %vm179_vm7, %v174_v30, 0.0 }
  0xb6   :  { %v162_v33 = vmul.f32 %v1226_v28, %v155_v32  ;;  %v187_v44 = vmul.f32 %v1228_v37, %v180_v38 }
  0xb8   :  { %v194_v35 = vpop.permute.xlu1 %193  ;;  %v151_v36 = vpop.permute.xlu0 %150  ;;  %v171_v40 = vadd.f32 %v169_v34, %v162_v33 }
  0xb9   :  { %v156_v39 = vsel %vm154_vm6, 0.0, %v151_v36  ;;  %v198_v48 = vsel %vm154_vm6, 0.0, %v194_v35 }
  0xba   :  { %v163_v41 = vmul.f32 %v1226_v28, %v156_v39  ;;  %v189_v54 = vadd.f32 %v187_v44, %v171_v40  ;;  %v205_v57 = vmul.f32 %v1229_v47, %v198_v48  ;;  %v1234_v28 = vld [vmem:[#allocation5 + $0x8] ss:$0 sm:$0xff]  ;;  %v1235_v39 = vld [vmem:[#allocation5 + $0x27] ss:$0 sm:$0xff] }
  0xbc   :  { %v176_v45 = vpop.permute.xlu1 %175  ;;  %v192_v46 = vpop.permute.xlu0 %191  ;;  %v172_v52 = vadd.f32 %v170_v42, %v163_v41 }
  0xbd   :  { %v181_v49 = vsel %vm179_vm7, %v176_v45, 0.0  ;;  %v197_v50 = vsel %vm154_vm6, 0.0, %v192_v46 }
  0xbe   :  { %v188_v53 = vmul.f32 %v1228_v37, %v181_v49  ;;  %v204_v55 = vmul.f32 %v1229_v47, %v197_v50 }
  0xc0   :  { %v190_v58 = vadd.f32 %v188_v53, %v172_v52  ;;  %v206_v59 = vadd.f32 %v204_v55, %v189_v54  ;;  %v220_v61 = vpop.permute.xlu1 %219  ;;  %v218_v62 = vpop.permute.xlu0 %217 }
  0xc1   :  { %v224_v63 = vsel %vm179_vm7, %v220_v61, 0.0  ;;  %v223_v0 = vsel %vm179_vm7, %v218_v62, 0.0 }
  0xc2   :  { %v207_v3 = vadd.f32 %v205_v57, %v190_v58  ;;  %v215_v4 = vadd.f32 %v213_v51, %v206_v59  ;;  %v230_v8 = vmul.f32 %v1231_v56, %v223_v0  ;;  %v231_v13 = vmul.f32 %v1231_v56, %v224_v63 }
  0xc4   :  { %v216_v10 = vadd.f32 %v214_v60, %v207_v3  ;;  %v248_v14 = vpop.permute.xlu1 %247  ;;  %v246_v15 = vpop.permute.xlu0 %245  ;;  %v232_v21 = vadd.f32 %v230_v8, %v215_v4 }
  0xc5   :  { %v252_v17 = vsel %vm154_vm6, 0.0, %v248_v14  ;;  %v251_v18 = vsel %vm154_vm6, 0.0, %v246_v15 }
  0xc6   :  { %v233_v20 = vadd.f32 %v231_v13, %v216_v10  ;;  %v259_v23 = vmul.f32 %v1232_v9, %v252_v17  ;;  %v258_v25 = vmul.f32 %v1232_v9, %v251_v18  ;;  %v333_v18 = vld [vmem:[#allocation5 + $0x2e] sm:$0x1] }
  0xc8   :  { %v261_v29 = vadd.f32 %v259_v23, %v233_v20  ;;  %v260_v30 = vadd.f32 %v258_v25, %v232_v21  ;;  %v274_v31 = vpop.permute.xlu1 %273  ;;  %v272_v32 = vpop.permute.xlu0 %271  ;;  %v337_v21 = vld [vmem:[#allocation5 + $0x2f] sm:$0x1] }
  0xc9   :  { %v278_v33 = vsel %vm179_vm7, %v274_v31, 0.0  ;;  %v277_v34 = vsel %vm179_vm7, %v272_v32, 0.0 }
  0xca   :  { %v270_v35 = vadd.f32 %v268_v7, %v261_v29  ;;  %v285_v36 = vmul.f32 %v1234_v28, %v278_v33  ;;  %v269_v37 = vadd.f32 %v267_v19, %v260_v30  ;;  %v284_v38 = vmul.f32 %v1234_v28, %v277_v34 }
  0xcb   :  { %v1707_v7 = vsub.s32 0, %v1630_v1  ;;  %v75_v1 = vadd.s32 4294967294, %v1633_v2 }
  0xcc   :  { %v287_v26 = vadd.f32 %v285_v36, %v270_v35  ;;  %v286_v27 = vadd.f32 %v284_v38, %v269_v37  ;;  %v1237_v36 = vld [vmem:[#allocation5 + $0xa] ss:$0 sm:$0xff]  ;;  %v76_v37 = vadd.s32 4294967294, %v1637_v5  ;;  %v1246_v38 = vld [vmem:[#allocation5 + $0x11] ss:$0 sm:$0xff] }
  0xcd   :  { %vm77_vm10 = vcmp.ge.s32.totalorder %v75_v1, 0 }
  0xce   :  { %v294_v40 = vadd.f32 %v1235_v39, %v287_v26  ;;  %v293_v41 = vadd.f32 %v1235_v39, %v286_v27  ;;  %v1259_v39 = vld [vmem:[#allocation5 + $0x1c] ss:$0 sm:$0xff]  ;;  %v111_v26 = vadd.s32 2, %v1633_v2  ;;  %v112_v27 = vadd.s32 2, %v1637_v5 }
  0xcf   :  { %vm78_vm11 = vcmp.ge.s32.totalorder %v76_v37, 0 }
  0xd0   :  { %v303_v42 = vmul.f32 %v294_v40, %v294_v40  ;;  %v302_v43 = vmul.f32 %v293_v41, %v293_v41  ;;  %v295_v44 = vadd.f32 %v294_v40, %v293_v41  ;;  %vm115_vm12 = vcmp.lt.s32.totalorder %v111_v26, 8 }
  0xd1   :  { %vm116_vm13 = vcmp.lt.s32.totalorder %v112_v27, 8 }
  0xd2   :  { %v296_v45 = vrot.slane %v295_v44, 4  ;;  %v304_v46 = vadd.f32 %v303_v42, %v302_v43 }
  0xd4   :  { %v297_v47 = vadd.f32 %v296_v45, %v295_v44  ;;  %v305_v48 = vrot.slane %v304_v46, 4  ;;  %v63_v44 = vadd.s32 4294967293, %v1633_v2 }
  0xd6   :  { %v298_v49 = vrot.slane %v297_v47, 2  ;;  %v306_v50 = vadd.f32 %v305_v48, %v304_v46  ;;  %v1244_v48 = vld [vmem:[#allocation5 + $0xf] ss:$0 sm:$0xff]  ;;  %vm65_vm14 = vcmp.ge.s32.totalorder %v63_v44, 0 }
  0xd8   :  { %v299_v51 = vadd.f32 %v298_v49, %v297_v47  ;;  %v307_v52 = vrot.slane %v306_v50, 2 }
  0xda   :  { %v300_v53 = vrot.slane %v299_v51, 1  ;;  %v308_v54 = vadd.f32 %v307_v52, %v306_v50  ;;  %v64_v50 = vadd.s32 4294967293, %v1637_v5 }
  0xdc   :  { %v301_v55 = vadd.f32 %v300_v53, %v299_v51  ;;  %v309_v56 = vrot.slane %v308_v54, 1  ;;  %v1245_v51 = vld [vmem:[#allocation5 + $0x10] ss:$0 sm:$0xff]  ;;  %vm66_vm1 = vcmp.ge.s32.totalorder %v64_v50, 0 }
  0xde   :  { %311 = vrot.lane.b32.xlu0 %v301_v55, %s1551_s21  ;;  %v310_v57 = vadd.f32 %v309_v56, %v308_v54  ;;  %v1731_v56 = vsel %vm77_vm10, 1.0, %v1549_v11 }
  0xe0   :  { %314 = vrot.lane.b32.xlu1 %v310_v57, %s1551_s21 }
 0x150   :  { %v312_v58 = vpop.permute.xlu0 %311 }
 0x151   :  { %v313_v59 = vadd.f32 %v312_v58, %v301_v55  ;;  %v1236_v58 = vld [vmem:[#allocation5 + $0x9] ss:$0 sm:$0xff] }
 0x152   :  { %v315_v60 = vpop.permute.xlu1 %314 }
 0x153   :  { %v316_v61 = vadd.f32 %v315_v60, %v310_v57  ;;  %317 = vrot.lane.b32.xlu0 %v313_v59, %s1552_s22  ;;  %v123_v57 = vadd.s32 3, %v1633_v2  ;;  %v1746_v2 = vsel %vm116_vm13, 1.0, %v1549_v11 }
 0x155   :  { %320 = vrot.lane.b32.xlu1 %v316_v61, %s1552_s22  ;;  %vm127_vm2 = vcmp.lt.s32.totalorder %v123_v57, 8 }
 0x1c5   :  { %v318_v62 = vpop.permute.xlu0 %317 }
 0x1c6   :  { %v319_v63 = vadd.f32 %v318_v62, %v313_v59 }
 0x1c7   :  { %v321_v0 = vpop.permute.xlu1 %320 }
 0x1c8   :  { %v322_v3 = vadd.f32 %v321_v0, %v316_v61  ;;  %323 = vrot.lane.b32.xlu0 %v319_v63, %s1553_s23  ;;  %v1738_v61 = vsel %vm78_vm11, 1.0, %v1549_v11  ;;  %v1742_v0 = vsel %vm115_vm12, 1.0, %v1549_v11 }
 0x1ca   :  { %326 = vrot.lane.b32.xlu1 %v322_v3, %s1553_s23 }
 0x23a   :  { %v324_v4 = vpop.permute.xlu0 %323 }
 0x23b   :  { %v325_v8 = vadd.f32 %v324_v4, %v319_v63 }
 0x23c   :  { %v327_v6 = vpop.permute.xlu1 %326 }
 0x23d   :  { %v329_v9 = vmul.f32 0.0078125, %v325_v8  ;;  %v328_v10 = vadd.f32 %v327_v6, %v322_v3  ;;  %v1257_v8 = vld [vmem:[#allocation5 + $0x1a] ss:$0 sm:$0xff]  ;;  %v1256_v6 = vld [vmem:[#allocation5 + $0x19] ss:$0 sm:$0xff] }
 0x23f   :  { %v331_v13 = vmul.f32 %v329_v9, %v329_v9  ;;  %v330_v14 = vmul.f32 0.0078125, %v328_v10  ;;  %v1258_v10 = vld [vmem:[#allocation5 + $0x1b] ss:$0 sm:$0xff] }
 0x241   :  { %v332_v15 = vsub.f32 %v330_v14, %v331_v13 }
 0x243   :  { %v334_v17 = vadd.f32 1e-05, %v332_v15 }
 0x245   :  { %1442 = vrsqrt.f32 %v334_v17 }
 0x24f   :  { %v1443_v19 = vpop.eup %1442 }
 0x250   :  { %v336_v20 = vmul.f32 %v1443_v19, %v333_v18  ;;  %v1753_v18 = vsel %vm65_vm14, 1.0, %v1549_v11 }
 0x252   :  { %v338_v23 = vmul.f32 %v336_v20, %v329_v9  ;;  %v343_v25 = vrot.slane %v336_v20, %v1707_v7  ;;  %v1749_v9 = vadd.s32 3, %v1637_v5 }
 0x254   :  { %v339_v28 = vsub.f32 %v337_v21, %v338_v23  ;;  %v344_v29 = vmul.f32 %v343_v25, %v293_v41  ;;  %v345_v30 = vmul.f32 %v343_v25, %v294_v40 }
 0x256   :  { %v349_v31 = vrot.slane %v339_v28, %v1707_v7 }
 0x258   :  { %v350_v32 = vadd.f32 %v349_v31, %v344_v29  ;;  %v351_v33 = vadd.f32 %v349_v31, %v345_v30 }
 0x25a   :  { %v352_v34 = vmax.f32 %v350_v32, 0.0  ;;  %v353_v35 = vmax.f32 %v351_v33, 0.0  ;;  %v1238_v32 = vld [vmem:[#allocation5 + $0xb] ss:$0 sm:$0xff]  ;;  %v1247_v33 = vld [vmem:[#allocation5 + $0x12] ss:$0 sm:$0xff] }
 0x25c   :  { %358 = vrot.lane.b32.xlu1 %v353_v35, %s1551_s21  ;;  %356 = vrot.lane.b32.xlu0 %v352_v34, %s1551_s21  ;;  %v377_v42 = vmul.f32 %v1237_v36, %v353_v35  ;;  %v376_v43 = vmul.f32 %v1237_v36, %v352_v34  ;;  %v544_v45 = vmul.f32 %v1246_v38, %v353_v35 }
 0x25d   :  { %v543_v46 = vmul.f32 %v1246_v38, %v352_v34  ;;  %v1722_v47 = vmul.f32 %v1259_v39, %v353_v35  ;;  %v1724_v49 = vmul.f32 %v1259_v39, %v352_v34  ;;  %v1260_v39 = vld [vmem:[#allocation5 + $0x1d] ss:$0 sm:$0xff] }
 0x260   :  { %515 = vrot.lane.b32.xlu1 %v353_v35, %s1552_s22  ;;  %513 = vrot.lane.b32.xlu0 %v352_v34, %s1552_s22 }
 0x264   :  { %728 = vrot.lane.b32.xlu1 %v353_v35, %s1554_s26  ;;  %726 = vrot.lane.b32.xlu0 %v352_v34, %s1554_s26 }
 0x268   :  { %382 = vrot.lane.b32.xlu1 %v353_v35, %s1550_s2  ;;  %380 = vrot.lane.b32.xlu0 %v352_v34, %s1550_s2 }
 0x26c   :  { %558 = vrot.lane.b32.xlu1 %v353_v35, %s1555_s27  ;;  %556 = vrot.lane.b32.xlu0 %v352_v34, %s1555_s27 }
 0x270   :  { %789 = vrot.lane.b32.xlu1 %v353_v35, %s1556_s28  ;;  %787 = vrot.lane.b32.xlu0 %v352_v34, %s1556_s28  ;;  %v1759_v34 = vsel %vm66_vm1, 1.0, %v1549_v11  ;;  %v1762_v35 = vsel %vm127_vm2, 1.0, %v1549_v11 }
 0x2ce   :  { %v359_v40 = vpop.permute.xlu1 %358  ;;  %v357_v41 = vpop.permute.xlu0 %356 }
 0x2cf   :  { %v363_v52 = vsel %vm154_vm6, 0.0, %v359_v40  ;;  %v362_v53 = vsel %vm154_vm6, 0.0, %v357_v41  ;;  %vm583_vm6 = vcmask 1041408  }
 0x2d0   :  { %v535_v3 = vmul.f32 %v1245_v51, %v363_v52  ;;  %v534_v4 = vmul.f32 %v1245_v51, %v362_v53  ;;  %v370_v13 = vmul.f32 %v1236_v58, %v363_v52  ;;  %v369_v14 = vmul.f32 %v1236_v58, %v362_v53  ;;  %v1248_v58 = vld [vmem:[#allocation5 + $0x13] ss:$0 sm:$0xff] }
 0x2d1   :  { %v757_v30 = vmul.f32 %v1258_v10, %v363_v52  ;;  %v756_v31 = vmul.f32 %v1258_v10, %v362_v53 }
 0x2d2   :  { %v516_v54 = vpop.permute.xlu1 %515  ;;  %v514_v55 = vpop.permute.xlu0 %513  ;;  %v379_v1 = vadd.f32 %v377_v42, %v370_v13  ;;  %v378_v36 = vadd.f32 %v376_v43, %v369_v14 }
 0x2d3   :  { %v521_v59 = vsel %vm519_vm8, 0.0, %v516_v54  ;;  %v520_v60 = vsel %vm519_vm8, 0.0, %v514_v55  ;;  %v1239_v54 = vld [vmem:[#allocation5 + $0x28] ss:$0 sm:$0xff]  ;;  %vm128_vm8 = vcmp.lt.s32.totalorder %v1749_v9, 8 }
 0x2d4   :  { %v528_v62 = vmul.f32 %v1244_v48, %v521_v59  ;;  %v527_v63 = vmul.f32 %v1244_v48, %v520_v60  ;;  %v748_v25 = vmul.f32 %v1257_v8, %v521_v59  ;;  %v747_v28 = vmul.f32 %v1257_v8, %v520_v60 }
 0x2d6   :  { %v729_v15 = vpop.permute.xlu1 %728  ;;  %v727_v17 = vpop.permute.xlu0 %726  ;;  %v537_v19 = vadd.f32 %v535_v3, %v528_v62  ;;  %v536_v20 = vadd.f32 %v534_v4, %v527_v63  ;;  %v1241_v4 = vld [vmem:[#allocation5 + $0xd] ss:$0 sm:$0xff] }
 0x2d7   :  { %v734_v21 = vsel %vm732_vm9, 0.0, %v729_v15  ;;  %v733_v23 = vsel %vm732_vm9, 0.0, %v727_v17  ;;  %vm907_vm9 = vcmask 1044480  }
 0x2d8   :  { %v741_v5 = vmul.f32 %v1256_v6, %v734_v21  ;;  %v740_v29 = vmul.f32 %v1256_v6, %v733_v23  ;;  %v546_v40 = vadd.f32 %v544_v45, %v537_v19  ;;  %v545_v41 = vadd.f32 %v543_v46, %v536_v20  ;;  %v1261_v46 = vld [vmem:[#allocation5 + $0x1e] ss:$0 sm:$0xff] }
 0x2da   :  { %v750_v37 = vadd.f32 %v748_v25, %v741_v5  ;;  %v749_v38 = vadd.f32 %v747_v28, %v740_v29  ;;  %v383_v26 = vpop.permute.xlu1 %382  ;;  %v381_v27 = vpop.permute.xlu0 %380 }
 0x2db   :  { %v387_v44 = vsel %vm179_vm7, %v383_v26, 0.0  ;;  %v386_v48 = vsel %vm179_vm7, %v381_v27, 0.0  ;;  %vm814_vm7 = vcmask 1042432  }
 0x2dc   :  { %v759_v51 = vadd.f32 %v757_v30, %v750_v37  ;;  %v758_v50 = vadd.f32 %v756_v31, %v749_v38  ;;  %v394_v52 = vmul.f32 %v1238_v32, %v387_v44  ;;  %v553_v53 = vmul.f32 %v1247_v33, %v387_v44  ;;  %v1252_v37 = vld [vmem:[#allocation5 + $0x16] ss:$0 sm:$0xff] }
 0x2dd   :  { %v775_v55 = vmul.f32 %v1260_v39, %v387_v44  ;;  %v393_v57 = vmul.f32 %v1238_v32, %v386_v48  ;;  %v552_v42 = vmul.f32 %v1247_v33, %v386_v48  ;;  %v774_v43 = vmul.f32 %v1260_v39, %v386_v48 }
 0x2de   :  { %v396_v59 = vadd.f32 %v394_v52, %v379_v1  ;;  %v555_v60 = vadd.f32 %v553_v53, %v546_v40  ;;  %v768_v62 = vadd.f32 %v1722_v47, %v759_v51  ;;  %v767_v45 = vadd.f32 %v1724_v49, %v758_v50  ;;  %v559_v63 = vpop.permute.xlu1 %558  ;;  %v557_v3 = vpop.permute.xlu0 %556  ;;  %v1249_v47 = vld [vmem:[#allocation5 + $0x2a] ss:$0 sm:$0xff]  ;;  %v1242_v1 = vld [vmem:[#allocation5 + $0xe] ss:$0 sm:$0xff]  ;;  %v1240_v40 = vld [vmem:[#allocation5 + $0xc] ss:$0 sm:$0xff] }
 0x2df   :  { %v395_v8 = vadd.f32 %v393_v57, %v378_v36  ;;  %v554_v6 = vadd.f32 %v552_v42, %v545_v41  ;;  %v564_v10 = vsel %vm562_vm15, %v559_v63, 0.0  ;;  %v563_v13 = vsel %vm562_vm15, %v557_v3, 0.0 }
 0x2e0   :  { %v403_v14 = vadd.f32 %v1239_v54, %v396_v59  ;;  %v777_v15 = vadd.f32 %v775_v55, %v768_v62  ;;  %v776_v17 = vadd.f32 %v774_v43, %v767_v45  ;;  %v571_v19 = vmul.f32 %v1248_v58, %v564_v10  ;;  %v1262_v59 = vld [vmem:[#allocation5 + $0x1f] ss:$0 sm:$0xff] }
 0x2e1   :  { %v402_v20 = vadd.f32 %v1239_v54, %v395_v8  ;;  %v784_v21 = vmul.f32 %v1261_v46, %v564_v10  ;;  %v570_v49 = vmul.f32 %v1248_v58, %v563_v13  ;;  %v783_v23 = vmul.f32 %v1261_v46, %v563_v13 }
 0x2e2   :  { %v407_v25 = vrot.slane %v403_v14, 7  ;;  %v1770_v28 = vmul.f32 %v1241_v4, %v403_v14  ;;  %v431_v5 = vrot.slane %v403_v14, 1  ;;  %v573_v29 = vadd.f32 %v571_v19, %v555_v60  ;;  %v790_v54 = vpop.permute.xlu1 %789  ;;  %v788_v55 = vpop.permute.xlu0 %787 }
 0x2e3   :  { %v406_v30 = vrot.slane %v402_v20, 7  ;;  %v426_v31 = vmul.f32 %v1241_v4, %v402_v20  ;;  %v430_v32 = vrot.slane %v402_v20, 1  ;;  %v786_v33 = vadd.f32 %v784_v21, %v777_v15 }
 0x2e4   :  { %v435_v36 = vsel %vm234_vm4, %v431_v5, 0.0  ;;  %v1773_v38 = vadd.f32 %v1249_v47, %v573_v29  ;;  %v572_v39 = vadd.f32 %v570_v49, %v554_v6  ;;  %v785_v26 = vadd.f32 %v783_v23, %v776_v17  ;;  %v1250_v49 = vld [vmem:[#allocation5 + $0x14] ss:$0 sm:$0xff]  ;;  %v1251_v29 = vld [vmem:[#allocation5 + $0x15] ss:$0 sm:$0xff] }
 0x2e5   :  { %v437_v27 = vmul.f32 %v1669_v22, %v435_v36  ;;  %v408_v41 = vsel %vm137_vm0, %v406_v30, %v407_v25  ;;  %v411_v44 = vsel %vm137_vm0, 0.0, %v406_v30  ;;  %v432_v48 = vsel %vm234_vm4, %v430_v32, %v431_v5  ;;  %v1263_v25 = vld [vmem:[#allocation5 + $0x2c] ss:$0 sm:$0xff]  ;;  %v1243_v36 = vld [vmem:[#allocation5 + $0x29] ss:$0 sm:$0xff] }
 0x2e6   :  { %v412_v51 = vmul.f32 %v1647_v12, %v411_v44  ;;  %v413_v50 = vmul.f32 %v1653_v16, %v408_v41  ;;  %v436_v52 = vmul.f32 %v1673_v24, %v432_v48  ;;  %v585_v53 = vrot.slane %v1773_v38, 6 }
 0x2e7   :  { %v444_v57 = vmul.f32 %v1242_v1, %v437_v27  ;;  %v600_v42 = vrot.slane %v1773_v38, 7  ;;  %v1785_v43 = vmul.f32 %v1252_v37, %v1773_v38  ;;  %v626_v58 = vrot.slane %v1773_v38, 1 }
 0x2e8   :  { %v419_v60 = vmul.f32 %v1240_v40, %v412_v51  ;;  %v420_v62 = vmul.f32 %v1240_v40, %v413_v50  ;;  %v443_v45 = vmul.f32 %v1242_v1, %v436_v52  ;;  %v644_v46 = vrot.slane %v1773_v38, 2 }
 0x2e9   :  { %v630_v63 = vsel %vm234_vm4, %v626_v58, 0.0  ;;  %v579_v3 = vadd.f32 %v1249_v47, %v572_v39  ;;  %v795_v4 = vsel %vm793_vm3, %v790_v54, 0.0  ;;  %v794_v8 = vsel %vm793_vm3, %v788_v55, 0.0 }
 0x2ea   :  { %v428_v6 = vadd.f32 %v426_v31, %v419_v60  ;;  %v632_v10 = vmul.f32 %v1669_v22, %v630_v63  ;;  %v648_v13 = vsel %vm642_vm5, %v644_v46, 0.0  ;;  %v802_v14 = vmul.f32 %v1262_v59, %v795_v4 }
 0x2eb   :  { %v584_v15 = vrot.slane %v579_v3, 6  ;;  %v599_v17 = vrot.slane %v579_v3, 7  ;;  %v621_v19 = vmul.f32 %v1252_v37, %v579_v3  ;;  %v625_v20 = vrot.slane %v579_v3, 1 }
 0x2ec   :  { %v445_v21 = vadd.f32 %v443_v45, %v428_v6  ;;  %v643_v23 = vrot.slane %v579_v3, 2  ;;  %v804_v47 = vadd.f32 %v802_v14, %v786_v33  ;;  %v801_v5 = vmul.f32 %v1262_v59, %v794_v8  ;;  %v1253_v59 = vld [vmem:[#allocation5 + $0x17] ss:$0 sm:$0xff] }
 0x2ed   :  { %v586_v30 = vsel %vm583_vm6, %v584_v15, %v585_v53  ;;  %v589_v31 = vsel %vm583_vm6, 0.0, %v584_v15  ;;  %v601_v32 = vsel %vm137_vm0, %v599_v17, %v600_v42  ;;  %v604_v1 = vsel %vm137_vm0, 0.0, %v599_v17  ;;  %v1254_v15 = vld [vmem:[#allocation5 + $0x18] ss:$0 sm:$0xff] }
 0x2ee   :  { %v590_v38 = vmul.f32 %v1731_v56, %v589_v31  ;;  %v591_v37 = vmul.f32 %v1738_v61, %v586_v30  ;;  %v605_v39 = vmul.f32 %v1647_v12, %v604_v1  ;;  %v606_v27 = vmul.f32 %v1653_v16, %v601_v32  ;;  %v1255_v1 = vld [vmem:[#allocation5 + $0x2b] ss:$0 sm:$0xff] }
 0x2ef   :  { %v627_v33 = vsel %vm234_vm4, %v625_v20, %v626_v58  ;;  %v1803_v40 = vadd.f32 %v1263_v25, %v804_v47  ;;  %v803_v41 = vadd.f32 %v801_v5, %v785_v26  ;;  %v429_v44 = vadd.f32 %v1770_v28, %v420_v62  ;;  %v1264_v5 = vld [vmem:[#allocation5 + $0x20] ss:$0 sm:$0xff] }
 0x2f0   :  { %v597_v48 = vmul.f32 %v1250_v49, %v590_v38  ;;  %v612_v51 = vmul.f32 %v1251_v29, %v605_v39  ;;  %v1806_v50 = vadd.f32 %v1243_v36, %v445_v21  ;;  %v598_v52 = vmul.f32 %v1250_v49, %v591_v37 }
 0x2f1   :  { %v816_v53 = vrot.slane %v1803_v40, 5  ;;  %v831_v54 = vrot.slane %v1803_v40, 6  ;;  %v848_v55 = vrot.slane %v1803_v40, 7  ;;  %v1811_v42 = vadd.f32 %v1263_v25, %v803_v41 }
 0x2f2   :  { %v614_v58 = vadd.f32 %v612_v51, %v597_v48  ;;  %v446_v60 = vadd.f32 %v444_v57, %v429_v44  ;;  %v461_v26 = vmul.f32 %v1806_v50, %v1806_v50  ;;  %v613_v28 = vmul.f32 %v1251_v29, %v606_v27  ;;  %v1265_v44 = vld [vmem:[#allocation5 + $0x21] ss:$0 sm:$0xff] }
 0x2f3   :  { %v815_v62 = vrot.slane %v1811_v42, 5  ;;  %v830_v45 = vrot.slane %v1811_v42, 6  ;;  %v847_v63 = vrot.slane %v1811_v42, 7  ;;  %v631_v3 = vmul.f32 %v1673_v24, %v627_v33 }
 0x2f4   :  { %v623_v4 = vadd.f32 %v621_v19, %v614_v58  ;;  %v1819_v8 = vadd.f32 %v1243_v36, %v446_v60  ;;  %v615_v6 = vadd.f32 %v613_v28, %v598_v52  ;;  %v639_v14 = vmul.f32 %v1253_v59, %v632_v10 }
 0x2f5   :  { %v638_v17 = vmul.f32 %v1253_v59, %v631_v3  ;;  %v645_v57 = vsel %vm642_vm5, %v643_v23, %v644_v46  ;;  %v650_v20 = vmul.f32 %v1746_v2, %v648_v13  ;;  %v817_v21 = vsel %vm814_vm7, %v815_v62, %v816_v53  ;;  %v1267_v3 = vld [vmem:[#allocation5 + $0x23] ss:$0 sm:$0xff] }
 0x2f6   :  { %v454_v49 = vadd.f32 %v1819_v8, %v1806_v50  ;;  %v462_v25 = vmul.f32 %v1819_v8, %v1819_v8  ;;  %v624_v19 = vadd.f32 %v1785_v43, %v615_v6  ;;  %v649_v47 = vmul.f32 %v1742_v0, %v645_v57 }
 0x2f7   :  { %v640_v10 = vadd.f32 %v638_v17, %v623_v4  ;;  %v657_v29 = vmul.f32 %v1254_v15, %v650_v20  ;;  %v820_v30 = vsel %vm814_vm7, 0.0, %v815_v62  ;;  %v822_v46 = vmul.f32 %v1759_v34, %v817_v21  ;;  %v1266_v62 = vld [vmem:[#allocation5 + $0x22] ss:$0 sm:$0xff] }
 0x2f8   :  { %v455_v13 = vrot.slane %v454_v49, 4  ;;  %v463_v23 = vadd.f32 %v462_v25, %v461_v26  ;;  %v641_v31 = vadd.f32 %v639_v14, %v624_v19  ;;  %v656_v32 = vmul.f32 %v1254_v15, %v649_v47 }
 0x2f9   :  { %v821_v36 = vmul.f32 %v1753_v18, %v820_v30  ;;  %v829_v38 = vmul.f32 %v1264_v5, %v822_v46  ;;  %v832_v37 = vsel %vm583_vm6, %v830_v45, %v831_v54  ;;  %v835_v43 = vsel %vm583_vm6, 0.0, %v830_v45 }
 0x2fa   :  { %v456_v39 = vadd.f32 %v455_v13, %v454_v49  ;;  %v464_v27 = vrot.slane %v463_v23, 4  ;;  %v658_v33 = vadd.f32 %v656_v32, %v640_v10  ;;  %v659_v41 = vadd.f32 %v657_v29, %v641_v31 }
 0x2fb   :  { %v828_v48 = vmul.f32 %v1264_v5, %v821_v36  ;;  %v836_v34 = vmul.f32 %v1731_v56, %v835_v43  ;;  %v837_v51 = vmul.f32 %v1738_v61, %v832_v37  ;;  %v849_v52 = vsel %vm137_vm0, %v847_v63, %v848_v55  ;;  %v1268_v43 = vld [vmem:[#allocation5 + $0x24] ss:$0 sm:$0xff] }
 0x2fc   :  { %v457_v53 = vrot.slane %v456_v39, 2  ;;  %v465_v59 = vadd.f32 %v464_v27, %v463_v23  ;;  %v1838_v18 = vadd.f32 %v1255_v1, %v658_v33  ;;  %v1840_v58 = vadd.f32 %v1255_v1, %v659_v41 }
 0x2fd   :  { %v843_v54 = vmul.f32 %v1265_v44, %v836_v34  ;;  %v844_v60 = vmul.f32 %v1265_v44, %v837_v51  ;;  %v852_v26 = vsel %vm137_vm0, 0.0, %v847_v63  ;;  %v854_v28 = vmul.f32 %v1653_v16, %v849_v52 }
 0x2fe   :  { %v458_v56 = vadd.f32 %v457_v53, %v456_v39  ;;  %v466_v45 = vrot.slane %v465_v59, 2  ;;  %v667_v61 = vadd.f32 %v1840_v58, %v1838_v18  ;;  %v674_v55 = vmul.f32 %v1838_v18, %v1838_v18 }
 0x2ff   :  { %v675_v4 = vmul.f32 %v1840_v58, %v1840_v58  ;;  %v845_v6 = vadd.f32 %v843_v54, %v828_v48  ;;  %v846_v14 = vadd.f32 %v844_v60, %v829_v38  ;;  %v853_v63 = vmul.f32 %v1647_v12, %v852_v26 }
 0x300   :  { %v459_v15 = vrot.slane %v458_v56, 1  ;;  %v467_v16 = vadd.f32 %v466_v45, %v465_v59  ;;  %v668_v17 = vrot.slane %v667_v61, 4  ;;  %v861_v57 = vmul.f32 %v1266_v62, %v854_v28 }
 0x301   :  { %v676_v20 = vadd.f32 %v675_v4, %v674_v55  ;;  %v860_v21 = vmul.f32 %v1266_v62, %v853_v63  ;;  %v869_v49 = vmul.f32 %v1267_v3, %v1811_v42  ;;  %v870_v25 = vmul.f32 %v1267_v3, %v1803_v40  ;;  %v1270_v62 = vld [vmem:[#allocation5 + $0x26] ss:$0 sm:$0xff] }
 0x302   :  { %v1854_v19 = vadd.f32 %v459_v15, %v458_v56  ;;  %v468_v47 = vrot.slane %v467_v16, 1  ;;  %v669_v5 = vadd.f32 %v668_v17, %v667_v61  ;;  %v863_v10 = vadd.f32 %v861_v57, %v846_v14 }
 0x303   :  { %v677_v29 = vrot.slane %v676_v20, 4  ;;  %v862_v30 = vadd.f32 %v860_v21, %v845_v6  ;;  %v873_v46 = vrot.slane %v1811_v42, 1  ;;  %v874_v12 = vrot.slane %v1803_v40, 1 }
 0x304   :  { %470 = vrot.lane.b32.xlu1 %v1854_v19, %s1551_s21  ;;  %v1860_v13 = vadd.f32 %v468_v47, %v467_v16  ;;  %v670_v23 = vrot.slane %v669_v5, 2  ;;  %v872_v31 = vadd.f32 %v870_v25, %v863_v10  ;;  %v890_v32 = vrot.slane %v1811_v42, 2  ;;  %v1271_v16 = vld [vmem:[#allocation5 + $0x2d] ss:$0 sm:$0xff] }
 0x305   :  { %v678_v1 = vadd.f32 %v677_v29, %v676_v20  ;;  %v871_v36 = vadd.f32 %v869_v49, %v862_v30  ;;  %v875_v38 = vsel %vm234_vm4, %v873_v46, %v874_v12  ;;  %v878_v37 = vsel %vm234_vm4, %v874_v12, 0.0 }
 0x306   :  { %v671_v39 = vadd.f32 %v670_v23, %v669_v5  ;;  %v879_v27 = vmul.f32 %v1673_v24, %v875_v38  ;;  %v880_v33 = vmul.f32 %v1669_v22, %v878_v37  ;;  %v891_v41 = vrot.slane %v1803_v40, 2  ;;  %v1269_v22 = vld [vmem:[#allocation5 + $0x25] ss:$0 sm:$0xff] }
 0x307   :  { %v679_v44 = vrot.slane %v678_v1, 2  ;;  %v1225_v48 = vsel %vm128_vm8, 1.0, %v1549_v11  ;;  %v908_v34 = vrot.slane %v1811_v42, 3  ;;  %v909_v51 = vrot.slane %v1803_v40, 3 }
 0x308   :  { %473 = vrot.lane.b32.xlu1 %v1860_v13, %s1551_s21  ;;  %v672_v52 = vrot.slane %v671_v39, 1  ;;  %v886_v53 = vmul.f32 %v1268_v43, %v879_v27  ;;  %v887_v59 = vmul.f32 %v1268_v43, %v880_v33  ;;  %v892_v24 = vsel %vm642_vm5, %v890_v32, %v891_v41 }
 0x309   :  { %v680_v54 = vadd.f32 %v679_v44, %v678_v1  ;;  %v895_v60 = vsel %vm642_vm5, %v891_v41, 0.0  ;;  %v896_v26 = vmul.f32 %v1742_v0, %v892_v24  ;;  %v910_v11 = vsel %vm907_vm9, %v908_v34, %v909_v51 }
 0x30a   :  { %v673_v9 = vadd.f32 %v672_v52, %v671_v39  ;;  %v888_v42 = vadd.f32 %v886_v53, %v871_v36  ;;  %v889_v28 = vadd.f32 %v887_v59, %v872_v31  ;;  %v897_v40 = vmul.f32 %v1746_v2, %v895_v60  ;;  %v1008_v60 = vld [vmem:[#allocation7 + $0x88] sm:$0xff] }
 0x30b   :  { %v681_v56 = vrot.slane %v680_v54, 1  ;;  %v903_v45 = vmul.f32 %v1269_v22, %v896_v26  ;;  %v913_v61 = vsel %vm907_vm9, %v909_v51, 0.0  ;;  %v914_v55 = vmul.f32 %v1762_v35, %v910_v11  ;;  %v991_v26 = vld [vmem:[#allocation7] sm:$0xff] }
 0x30c   :  { %683 = vrot.lane.b32.xlu0 %v673_v9, %s1551_s21  ;;  %v904_v3 = vmul.f32 %v1269_v22, %v897_v40  ;;  %v915_v4 = vmul.f32 %v1225_v48, %v913_v61 }
 0x30d   :  { %v905_v6 = vadd.f32 %v903_v45, %v888_v42  ;;  %v921_v0 = vmul.f32 %v1270_v62, %v914_v55  ;;  %v682_v14 = vadd.f32 %v681_v56, %v680_v54  ;;  %v1007_v54 = vld [vmem:[#allocation7 + $0x80] sm:$0xff]  ;;  %v1010_v56 = vld [vmem:[#allocation7 + $0x98] sm:$0xff]  ;;  %v993_v45 = vld [vmem:[#allocation7 + $0x10] sm:$0xff] }
 0x30e   :  { %v906_v63 = vadd.f32 %v904_v3, %v889_v28  ;;  %v922_v15 = vmul.f32 %v1270_v62, %v915_v4  ;;  %v1364_v11 = vpack.c.bf16 %v1008_v60, %v1007_v54  ;;  %v1009_v62 = vld [vmem:[#allocation7 + $0x90] sm:$0xff]  ;;  %v994_v55 = vld [vmem:[#allocation7 + $0x18] sm:$0xff]  ;;  %v1023_v4 = vld [vmem:[#allocation7 + $0x100] sm:$0xff] }
 0x30f   :  { %v923_v17 = vadd.f32 %v921_v0, %v905_v6  ;;  %v1368_v61 = vpack.c.bf16 %v1010_v56, %v1009_v62  ;;  %v1370_v3 = vpack.c.bf16 %v994_v55, %v993_v45  ;;  %v1024_v6 = vld [vmem:[#allocation7 + $0x108] sm:$0xff]  ;;  %v1002_v54 = vld [vmem:[#allocation7 + $0x58] sm:$0xff]  ;;  %v1019_v60 = vld [vmem:[#allocation7 + $0xe0] sm:$0xff] }
 0x310   :  { %686 = vrot.lane.b32.xlu0 %v682_v14, %s1551_s21  ;;  %v924_v2 = vadd.f32 %v922_v15, %v906_v63  ;;  %1365 = vmatprep.subr.bf16.mxu0 %v1364_v11  ;;  %v1011_v63 = vld [vmem:[#allocation7 + $0xa0] sm:$0xff]  ;;  %v1012_v15 = vld [vmem:[#allocation7 + $0xa8] sm:$0xff]  ;;  %v1022_v55 = vld [vmem:[#allocation7 + $0xf8] sm:$0xff] }
 0x311   :  { %v1884_v57 = vadd.f32 %v1271_v16, %v923_v17  ;;  %v1003_v56 = vld [vmem:[#allocation7 + $0x60] sm:$0xff]  ;;  %v1004_v45 = vld [vmem:[#allocation7 + $0x68] sm:$0xff] }
 0x312   :  { %v1886_v20 = vadd.f32 %v1271_v16, %v924_v2  ;;  %v995_v16 = vld [vmem:[#allocation7 + $0x20] sm:$0xff]  ;;  %v1372_v2 = vpack.c.bf16 %v1012_v15, %v1011_v63  ;;  %v1005_v63 = vld [vmem:[#allocation7 + $0x70] sm:$0xff]  ;;  %v1006_v15 = vld [vmem:[#allocation7 + $0x78] sm:$0xff] }
 0x313   :  { %v939_v35 = vmul.f32 %v1884_v57, %v1884_v57 }
 0x314   :  { %v932_v21 = vadd.f32 %v1886_v20, %v1884_v57  ;;  %v940_v49 = vmul.f32 %v1886_v20, %v1886_v20 }
 0x316   :  { %v933_v25 = vrot.slane %v932_v21, 4  ;;  %v941_v47 = vadd.f32 %v940_v49, %v939_v35  ;;  %v996_v35 = vld [vmem:[#allocation7 + $0x28] sm:$0xff]  ;;  %v1026_v49 = vld [vmem:[#allocation7 + $0x118] sm:$0xff] }
 0x318   :  { %v934_v5 = vadd.f32 %v933_v25, %v932_v21  ;;  %v942_v10 = vrot.slane %v941_v47, 4  ;;  %v1025_v21 = vld [vmem:[#allocation7 + $0x110] sm:$0xff] }
 0x31a   :  { %v935_v29 = vrot.slane %v934_v5, 2  ;;  %v943_v30 = vadd.f32 %v942_v10, %v941_v47  ;;  %v1374_v47 = vpack.c.bf16 %v996_v35, %v995_v16  ;;  %v1013_v10 = vld [vmem:[#allocation7 + $0xb0] sm:$0xff] }
 0x31b   :  { %v1037_v35 = vld [vmem:[#allocation7 + $0x170] sm:$0xff] }
 0x31c   :  { %v936_v46 = vadd.f32 %v935_v29, %v934_v5  ;;  %v944_v12 = vrot.slane %v943_v30, 2  ;;  %v1400_v5 = vpack.c.bf16 %v1026_v49, %v1025_v21  ;;  %v1014_v29 = vld [vmem:[#allocation7 + $0xb8] sm:$0xff] }
 0x31d   :  { %v1038_v21 = vld [vmem:[#allocation7 + $0x178] sm:$0xff] }
 0x31e   :  { %v937_v23 = vrot.slane %v936_v46, 1  ;;  %v945_v31 = vadd.f32 %v944_v12, %v943_v30  ;;  %v997_v30 = vld [vmem:[#allocation7 + $0x30] sm:$0xff]  ;;  %v1376_v12 = vpack.c.bf16 %v1014_v29, %v1013_v10  ;;  %v1424_v49 = vpack.c.bf16 %v1038_v21, %v1037_v35 }
 0x320   :  { %v938_v32 = vadd.f32 %v937_v23, %v936_v46  ;;  %v946_v1 = vrot.slane %v945_v31, 1  ;;  %v998_v23 = vld [vmem:[#allocation7 + $0x38] sm:$0xff] }
 0x322   :  { %948 = vrot.lane.b32.xlu0 %v938_v32, %s1551_s21  ;;  %v947_v36 = vadd.f32 %v946_v1, %v945_v31  ;;  %v1027_v31 = vld [vmem:[#allocation7 + $0x120] sm:$0xff] }
 0x324   :  { %951 = vrot.lane.b32.xlu1 %v947_v36, %s1551_s21 }
 0x376   :  { %v471_v38 = vpop.permute.xlu1 %470 }
 0x377   :  { %v472_v37 = vadd.f32 %v471_v38, %v1854_v19  ;;  %v1016_v38 = vld [vmem:[#allocation7 + $0xc8] sm:$0xff] }
 0x379   :  { %476 = vrot.lane.b32.xlu1 %v472_v37, %s1552_s22 }
 0x37a   :  { %v474_v43 = vpop.permute.xlu1 %473 }
 0x37b   :  { %v475_v39 = vadd.f32 %v474_v43, %v1860_v13  ;;  %v1029_v43 = vld [vmem:[#allocation7 + $0x130] sm:$0xff] }
 0x37d   :  { %479 = vrot.lane.b32.xlu1 %v475_v39, %s1552_s22 }
 0x37e   :  { %v684_v27 = vpop.permute.xlu0 %683 }
 0x37f   :  { %v685_v33 = vadd.f32 %v684_v27, %v673_v9  ;;  %v992_v9 = vld [vmem:[#allocation7 + $0x8] sm:$0xff] }
 0x380   :  { %v1366_v28 = vpack.c.bf16 %v992_v9, %v991_v26  ;;  %v1020_v26 = vld [vmem:[#allocation7 + $0xe8] sm:$0xff] }
 0x381   :  { %689 = vrot.lane.b32.xlu0 %v685_v33, %s1552_s22  ;;  %v1388_v62 = vpack.c.bf16 %v1020_v26, %v1019_v60  ;;  %v709_v60 = vld [vmem:[#allocation5 + $0x33] sm:$0x1] }
 0x382   :  { %v687_v41 = vpop.permute.xlu0 %686  ;;  %1367 = vmatpush3.bf16.msra.mxu0 %v1366_v28  ;;  %v1034_v28 = vld [vmem:[#allocation7 + $0x158] sm:$0xff] }
 0x383   :  { %v688_v44 = vadd.f32 %v687_v41, %v682_v14  ;;  %1369 = vmatprep.subr.bf16.mxu0 %v1368_v61  ;;  %v1396_v14 = vpack.c.bf16 %v1024_v6, %v1023_v4  ;;  %v1000_v41 = vld [vmem:[#allocation7 + $0x48] sm:$0xff]  ;;  %v1021_v61 = vld [vmem:[#allocation7 + $0xf0] sm:$0xff]  ;;  %v1390_v4 = vpack.c.bf16 %v1004_v45, %v1003_v56  ;;  %v1035_v6 = vld [vmem:[#allocation7 + $0x160] sm:$0xff] }
 0x385   :  { %692 = vrot.lane.b32.xlu0 %v688_v44, %s1552_s22  ;;  %1397 = vmatprep.subr.bf16.mxu1 %v1396_v14 }
 0x386   :  { %1371 = vmatpush3.bf16.msra.mxu0 %v1370_v3  ;;  %1399 = vmatpush3.bf16.msra.mxu1 %v1396_v14  ;;  %v1392_v14 = vpack.c.bf16 %v1022_v55, %v1021_v61 }
 0x387   :  { %1373 = vmatprep.subr.bf16.mxu0 %v1372_v2  ;;  %1401 = vmatprep.subr.bf16.mxu1 %v1400_v5  ;;  %v1394_v2 = vpack.c.bf16 %v1006_v15, %v1005_v63 }
 0x38a   :  { %1375 = vmatpush3.bf16.msra.mxu0 %v1374_v47  ;;  %1403 = vmatpush3.bf16.msra.mxu1 %v1400_v5 }
 0x38b   :  { %1377 = vmatprep.subr.bf16.mxu0 %v1376_v12 }
 0x394   :  { %v949_v48 = vpop.permute.xlu0 %948 }
 0x395   :  { %v950_v34 = vadd.f32 %v949_v48, %v938_v32  ;;  %v1028_v32 = vld [vmem:[#allocation7 + $0x128] sm:$0xff]  ;;  %v1018_v48 = vld [vmem:[#allocation7 + $0xd8] sm:$0xff] }
 0x396   :  { %v952_v51 = vpop.permute.xlu1 %951  ;;  %v1404_v1 = vpack.c.bf16 %v1028_v32, %v1027_v31 }
 0x397   :  { %v953_v52 = vadd.f32 %v952_v51, %v947_v36  ;;  %954 = vrot.lane.b32.xlu0 %v950_v34, %s1552_s22  ;;  %v1015_v36 = vld [vmem:[#allocation7 + $0xc0] sm:$0xff] }
 0x398   :  { %v1380_v27 = vpack.c.bf16 %v1016_v38, %v1015_v36  ;;  %1405 = vmatprep.subr.bf16.mxu1 %v1404_v1 }
 0x399   :  { %957 = vrot.lane.b32.xlu1 %v953_v52, %s1552_s22  ;;  %1407 = vmatpush3.bf16.msra.mxu1 %v1404_v1 }
 0x3eb   :  { %v477_v19 = vpop.permute.xlu1 %476 }
 0x3ec   :  { %v1904_v13 = vadd.f32 %v477_v19, %v472_v37  ;;  %v1378_v37 = vpack.c.bf16 %v998_v23, %v997_v30  ;;  %v1032_v19 = vld [vmem:[#allocation7 + $0x148] sm:$0xff] }
 0x3ee   :  { %482 = vrot.lane.b32.xlu1 %v1904_v13, %s1553_s23  ;;  %1379 = vmatpush3.bf16.msra.mxu0 %v1378_v37 }
 0x3ef   :  { %v480_v53 = vpop.permute.xlu1 %479  ;;  %1381 = vmatprep.subr.bf16.mxu0 %v1380_v27 }
 0x3f0   :  { %v1908_v59 = vadd.f32 %v480_v53, %v475_v39  ;;  %v1030_v39 = vld [vmem:[#allocation7 + $0x138] sm:$0xff] }
 0x3f2   :  { %485 = vrot.lane.b32.xlu1 %v1908_v59, %s1553_s23 }
 0x3f3   :  { %v690_v24 = vpop.permute.xlu0 %689 }
 0x3f4   :  { %v1912_v22 = vadd.f32 %v690_v24, %v685_v33  ;;  %v999_v33 = vld [vmem:[#allocation7 + $0x40] sm:$0xff]  ;;  %v1001_v24 = vld [vmem:[#allocation7 + $0x50] sm:$0xff] }
 0x3f5   :  { %v1382_v51 = vpack.c.bf16 %v1000_v41, %v999_v33  ;;  %v1386_v9 = vpack.c.bf16 %v1002_v54, %v1001_v24  ;;  %v492_v33 = vld [vmem:[#allocation5 + $0x30] sm:$0x1] }
 0x3f6   :  { %695 = vrot.lane.b32.xlu0 %v1912_v22, %s1553_s23 }
 0x3f7   :  { %v693_v42 = vpop.permute.xlu0 %692  ;;  %1383 = vmatpush3.bf16.msra.mxu0 %v1382_v51 }
 0x3f8   :  { %v1916_v40 = vadd.f32 %v693_v42, %v688_v44  ;;  %v1017_v44 = vld [vmem:[#allocation7 + $0xd0] sm:$0xff] }
 0x3f9   :  { %v1384_v53 = vpack.c.bf16 %v1018_v48, %v1017_v44  ;;  %v1033_v42 = vld [vmem:[#allocation7 + $0x150] sm:$0xff]  ;;  %v496_v48 = vld [vmem:[#allocation5 + $0x31] sm:$0x1] }
 0x3fa   :  { %698 = vrot.lane.b32.xlu0 %v1916_v40, %s1553_s23  ;;  %v1416_v3 = vpack.c.bf16 %v1034_v28, %v1033_v42 }
 0x3fb   :  { %1385 = vmatprep.subr.bf16.mxu0 %v1384_v53 }
 0x3fc   :  { %1387 = vmatpush3.bf16.msra.mxu0 %v1386_v9 }
 0x3fd   :  { %1389 = vmatprep.subr.bf16.mxu0 %v1388_v62 }
 0x400   :  { %1391 = vmatpush3.bf16.msra.mxu0 %v1390_v4 }
 0x401   :  { %1393 = vmatprep.subr.bf16.mxu0 %v1392_v14 }
 0x404   :  { %1395 = vmatpush3.bf16.msra.mxu0 %v1394_v2 }
 0x409   :  { %v955_v0 = vpop.permute.xlu0 %954 }
 0x40a   :  { %v1920_v17 = vadd.f32 %v955_v0, %v950_v34  ;;  %v1408_v34 = vpack.c.bf16 %v1030_v39, %v1029_v43  ;;  %v1036_v0 = vld [vmem:[#allocation7 + $0x168] sm:$0xff] }
 0x40b   :  { %v958_v25 = vpop.permute.xlu1 %957  ;;  %v1420_v16 = vpack.c.bf16 %v1036_v0, %v1035_v6 }
 0x40c   :  { %v1922_v46 = vadd.f32 %v958_v25, %v953_v52  ;;  %960 = vrot.lane.b32.xlu0 %v1920_v17, %s1553_s23  ;;  %v1031_v52 = vld [vmem:[#allocation7 + $0x140] sm:$0xff]  ;;  %1409 = vmatprep.subr.bf16.mxu1 %v1408_v34 }
 0x40d   :  { %v1412_v11 = vpack.c.bf16 %v1032_v19, %v1031_v52  ;;  %1411 = vmatpush3.bf16.msra.mxu1 %v1408_v34  ;;  %v705_v34 = vld [vmem:[#allocation5 + $0x32] sm:$0x1] }
 0x40e   :  { %963 = vrot.lane.b32.xlu1 %v1922_v46, %s1553_s23 }
 0x40f   :  { %1413 = vmatprep.subr.bf16.mxu1 %v1412_v11 }
 0x411   :  { %1415 = vmatpush3.bf16.msra.mxu1 %v1412_v11 }
 0x412   :  { %1417 = vmatprep.subr.bf16.mxu1 %v1416_v3 }
 0x415   :  { %1419 = vmatpush3.bf16.msra.mxu1 %v1416_v3 }
 0x416   :  { %1421 = vmatprep.subr.bf16.mxu1 %v1420_v16 }
 0x419   :  { %1423 = vmatpush3.bf16.msra.mxu1 %v1420_v16 }
 0x41a   :  { %1425 = vmatprep.subr.bf16.mxu1 %v1424_v49 }
 0x41d   :  { %1427 = vmatpush3.bf16.msra.mxu1 %v1424_v49 }
 0x460   :  { %v483_v25 = vpop.permute.xlu1 %482 }
 0x461   :  { %v484_v47 = vadd.f32 %v483_v25, %v1904_v13 }
 0x463   :  { %v488_v5 = vmul.f32 0.0078125, %v484_v47 }
 0x464   :  { %v486_v10 = vpop.permute.xlu1 %485 }
 0x465   :  { %v487_v29 = vadd.f32 %v486_v10, %v1908_v59  ;;  %v490_v30 = vmul.f32 %v488_v5, %v488_v5 }
 0x467   :  { %v489_v12 = vmul.f32 0.0078125, %v487_v29 }
 0x468   :  { %v696_v23 = vpop.permute.xlu0 %695 }
 0x469   :  { %v491_v31 = vsub.f32 %v489_v12, %v490_v30  ;;  %v697_v32 = vadd.f32 %v696_v23, %v1912_v22 }
 0x46b   :  { %v493_v1 = vadd.f32 1e-05, %v491_v31  ;;  %v701_v36 = vmul.f32 0.0078125, %v697_v32 }
 0x46c   :  { %v699_v38 = vpop.permute.xlu0 %698 }
 0x46d   :  { %1444 = vrsqrt.f32 %v493_v1  ;;  %v700_v37 = vadd.f32 %v699_v38, %v1916_v40  ;;  %v703_v43 = vmul.f32 %v701_v36, %v701_v36 }
 0x46f   :  { %v702_v39 = vmul.f32 0.0078125, %v700_v37 }
 0x471   :  { %v704_v27 = vsub.f32 %v702_v39, %v703_v43  ;;  %v1272_v43 = vld [vmem:[#allocation5 + $0x36] ss:$0 sm:$0xff] }
 0x473   :  { %v706_v13 = vadd.f32 1e-05, %v704_v27 }
 0x475   :  { %1446 = vrsqrt.f32 %v706_v13 }
 0x477   :  { %v1445_v41 = vpop.eup %1444 }
 0x478   :  { %v495_v59 = vmul.f32 %v1445_v41, %v492_v33 }
 0x47a   :  { %v497_v44 = vmul.f32 %v495_v59, %v488_v5  ;;  %v502_v26 = vrot.slane %v495_v59, %v1707_v7 }
 0x47c   :  { %v498_v19 = vsub.f32 %v496_v48, %v497_v44  ;;  %v504_v14 = vmul.f32 %v502_v26, %v1819_v8 }
 0x47e   :  { %v961_v51 = vpop.permute.xlu0 %960  ;;  %v508_v62 = vrot.slane %v498_v19, %v1707_v7 }
 0x47f   :  { %v1447_v52 = vpop.eup %1446  ;;  %v962_v22 = vadd.f32 %v961_v51, %v1920_v17  ;;  %v503_v17 = vmul.f32 %v502_v26, %v1806_v50 }
 0x480   :  { %v964_v53 = vpop.permute.xlu1 %963  ;;  %v708_v24 = vmul.f32 %v1447_v52, %v705_v34  ;;  %v510_v16 = vadd.f32 %v508_v62, %v504_v14 }
 0x481   :  { %v966_v54 = vmul.f32 0.0078125, %v962_v22  ;;  %v965_v40 = vadd.f32 %v964_v53, %v1922_v46  ;;  %v509_v4 = vadd.f32 %v508_v62, %v503_v17 }
 0x482   :  { %v710_v11 = vmul.f32 %v708_v24, %v701_v36  ;;  %v715_v9 = vrot.slane %v708_v24, %v1707_v7  ;;  %v512_v50 = vmax.f32 %v510_v16, 0.0 }
 0x483   :  { %v968_v42 = vmul.f32 %v966_v54, %v966_v54  ;;  %v967_v28 = vmul.f32 0.0078125, %v965_v40  ;;  %v511_v15 = vmax.f32 %v509_v4, 0.0 }
 0x484   :  { %v711_v56 = vsub.f32 %v709_v60, %v710_v11  ;;  %v716_v61 = vmul.f32 %v715_v9, %v1838_v18  ;;  %v717_v46 = vmul.f32 %v715_v9, %v1840_v58  ;;  %v970_v18 = vld [vmem:[#allocation5 + $0x34] sm:$0x1]  ;;  %v974_v58 = vld [vmem:[#allocation5 + $0x35] sm:$0x1] }
 0x485   :  { %v969_v45 = vsub.f32 %v967_v28, %v968_v42 }
 0x486   :  { %v721_v55 = vrot.slane %v711_v56, %v1707_v7 }
 0x487   :  { %v971_v3 = vadd.f32 1e-05, %v969_v45 }
 0x488   :  { %v722_v6 = vadd.f32 %v721_v55, %v716_v61  ;;  %v723_v0 = vadd.f32 %v721_v55, %v717_v46 }
 0x489   :  { %1448 = vrsqrt.f32 %v971_v3 }
 0x48a   :  { %v724_v63 = vmax.f32 %v722_v6, 0.0  ;;  %v725_v2 = vmax.f32 %v723_v0, 0.0 }
 0x48c   :  { %1108 = vmatprep.mubr.f32.mxu0 %v724_v63 }
 0x48d   :  { %1109 = vmatmul.mubr.f32.vlgmr.msra.gmra.mrb[0].mxu0 %v511_v15 }
 0x48e   :  { %1113 = vmatprep.mubr.f32.mxu0 %v725_v2 }
 0x491   :  { %1114 = vmatmul.mubr.f32.gmra.mrb[2].mxu0 %v512_v50 }
 0x493   :  { %v1449_v35 = vpop.eup %1448 }
 0x494   :  { %v973_v21 = vmul.f32 %v1449_v35, %v970_v18 }
 0x496   :  { %v975_v49 = vmul.f32 %v973_v21, %v966_v54  ;;  %v980_v25 = vrot.slane %v973_v21, %v1707_v7 }
 0x498   :  { %v976_v47 = vsub.f32 %v974_v58, %v975_v49  ;;  %v981_v5 = vmul.f32 %v980_v25, %v1884_v57  ;;  %v982_v10 = vmul.f32 %v980_v25, %v1886_v20 }
 0x49a   :  { %v986_v8 = vrot.slane %v976_v47, %v1707_v7 }
 0x49c   :  { %v987_v29 = vadd.f32 %v986_v8, %v981_v5  ;;  %v988_v30 = vadd.f32 %v986_v8, %v982_v10 }
 0x49e   :  { %v989_v12 = vmax.f32 %v987_v29, 0.0  ;;  %v990_v23 = vmax.f32 %v988_v30, 0.0 }
 0x4a0   :  { %1361 = vmatprep.mubr.f32.mxu1 %v989_v12 }
 0x4a1   :  { %1362 = vmatmul.mubr.f32.vlgmr.msra.gmra.mrb[0].mxu1 %v990_v23 }
 0x560   :  { %v1305_v31 = vpop.f32.mrb[0].mxu0 }
 0x561   :  { %v1306_v32 = vpop.f32.mrb[1].mxu0 }
 0x562   :  { %v1307_v1 = vadd.f32 %v1306_v32, %v1305_v31 }
 0x564   :  { %v1308_v36 = vpop.f32.mrb[2].mxu0  ;;  %v1111_v7 = vadd.f32 %v1307_v1, %v1272_v43 }
 0x565   :  { %v1309_v38 = vpop.f32.mrb[3].mxu0 }
 0x566   :  { %v1310_v37 = vadd.f32 %v1309_v38, %v1308_v36 }
 0x568   :  { %v1116_v39 = vadd.f32 %v1310_v37, %v1272_v43 }
 0x574   :  { %v1363_v57 = vpop.f32.mrb[0].mxu1 }
 0x575   :  { %v1191_v27 = vadd.f32 %v1363_v57, %v1116_v39  ;;  %v1185_v20 = vpop.f32.mrb[1].mxu1 }
 0x576   :  { %v1186_v13 = vadd.f32 %v1185_v20, %v1111_v7 }
 0x577   :  { %1195 = vst [vmem:[#allocation8 + $0x8] sm:$0xff] %v1191_v27 }
 0x578   :  { %1194 = vst [vmem:[#allocation8] sm:$0xff] %v1186_v13 }
 0x579   :  { %1527 = shalt.err (!%p1524_p0)
}
 0x57a   :  { %s1528_s7 = scalar_lea.hbm %s1964_s3, 256 }
 0x57b   :  { %p1529_p1 = scmp.ne.s32.totalorder %s1964_s3, %s1528_s7  ;;  %p1532_p2 = scmp.lt.u32.totalorder %s1528_s7, %s1964_s3 }
 0x57d   :  { %p1534_p3 = pnand %p1532_p2, %p1529_p1 }
 0x57f   :  { %1537 = shalt.err (!%p1534_p3)
}
 0x580   :  { %1207 = dma.vmem_to_hbm [thread:$0]  %s1202_s30, 256, %s1964_s3, [#allocation4], %s1546_s24, %s1546_s24, %s1547_s25  }
 0x581   :  { %1542 = dma.done.wait [#allocation4], 256  }
 0x582   :  { %1543 = vsyncadd [#allocation4], 4294967040 }
 0x583   :  { %1211 = vsyncpa [#allocation3], 1 }
 0x584   :  { %1212 = vsyncpa [#allocation6], 1 }
 0x585   :  { %1213 = vsyncpa [#allocation4], 1 }

</bundles_post_ra>
